<compile_context>
chip_gen: v5e
topology: v5e:2x2
jax: 0.10.0
libtpu: 0.0.40
codegen_flags: <defaults>
</compile_context>

<pallas_src>
import functools

import jax
import jax.numpy as jnp
import numpy as np
from jax.experimental import pallas as pl
from jax.experimental.pallas import tpu as pltpu


# TODO(synk): set to jnp.bfloat16 to halve HBM traffic of the (bandwidth-bound)
# Pallas passes (accumulation stays f32 via preferred_element_type); kept at f32
# so the 1e-4 reference check below holds.
_ACT_DTYPE = jnp.float32


def _cdiv(a, b):
    return (a + b - 1) // b


@functools.lru_cache(maxsize=None)
def _vmem_limit_bytes():
    """Generation-aware scoped-VMEM limit (v7x: 64 MiB physical; v5e/v6e: 128 MiB)."""
    cap = 0
    try:
        info = pltpu.get_tpu_info()
        for name in ("vmem_capacity_bytes", "vmem_size_bytes", "vmem_bytes"):
            cap = int(getattr(info, name, 0) or 0)
            if cap:
                break
    except Exception:
        cap = 0
    if not cap:
        return 32 * 1024 * 1024          # unknown part: conservative default
    if cap <= 64 * 1024 * 1024:
        return 40 * 1024 * 1024          # v7x: leave headroom below 64 MiB physical
    return 80 * 1024 * 1024              # v5e / v6e: 128 MiB physical, allow big tiles


@functools.lru_cache(maxsize=None)
def _compiler_params():
    return pltpu.CompilerParams(
        dimension_semantics=("parallel",),   # lane tiles independent; v7x shards across TCs
        vmem_limit_bytes=_vmem_limit_bytes(),
    )


def _choose_tm(n, tm_max, min_steps=4):
    """Lane-tile size: multiple of 128, <= tm_max.  Once tiles reach ~512 lanes,
    aim for >= min_steps grid steps (>= 2 per TensorCore on v7x) so the software
    pipeline has prefetch overlap on both cores."""
    if n < 128:
        return n                              # block == full (ragged) lane extent
    target = max(512, _cdiv(n, min_steps))
    return min(tm_max, _cdiv(target, 128) * 128, _cdiv(n, 128) * 128)


# ----------------------------------------------------------------------------
# Pallas kernel 1: fused channels-first pointwise (1x1) matmul + bias
#                  [+ residual] [+ relu]   ->  y = relu?(wT @ x + b [+ res])
# ----------------------------------------------------------------------------
def _make_pw_kernel(relu, has_res):
    if has_res:
        def kernel(x_ref, wT_ref, b_ref, r_ref, o_ref):
            y = jnp.dot(wT_ref[...], x_ref[...], preferred_element_type=jnp.float32)
            y = y + b_ref[...] + r_ref[...]
            o_ref[...] = (jnp.maximum(y, 0.0) if relu else y).astype(o_ref.dtype)
    else:
        def kernel(x_ref, wT_ref, b_ref, o_ref):
            y = jnp.dot(wT_ref[...], x_ref[...], preferred_element_type=jnp.float32)
            y = y + b_ref[...]
            o_ref[...] = (jnp.maximum(y, 0.0) if relu else y).astype(o_ref.dtype)
    return kernel


def pointwise_linear(x_cf, w, b, res=None, relu=False, tm_max=32768):
    """y = [relu](w^T @ x_cf + b [+ res]) over channels-first [C, N] lane tiles.

    x_cf: [Cin, N]; w: [Cin, Cout]; b: [Cout]; res: [Cout, N] or None.
    Channels sit on sublanes, N on lanes -> every DMA/VMEM tile and every store
    is lane-dense and unmasked.  grid = cdiv(N, tm), ragged last block masked.
    """
    cin, n = x_cf.shape
    cout = w.shape[1]
    tm = _choose_tm(n, tm_max)
    wT = w.T                                 # (Cout, Cin), tiny, VMEM-resident
    b_col = b.reshape(cout, 1)

    in_specs = [
        pl.BlockSpec((cin, tm), lambda i: (0, i)),     # activation tile (lane-dense)
        pl.BlockSpec((cout, cin), lambda i: (0, 0)),   # full (tiny) weight
        pl.BlockSpec((cout, 1), lambda i: (0, 0)),     # bias column
    ]
    args = [x_cf.astype(_ACT_DTYPE), wT, b_col]
    if res is not None:
        in_specs.append(pl.BlockSpec((cout, tm), lambda i: (0, i)))
        args.append(res.astype(_ACT_DTYPE))

    return pl.pallas_call(
        _make_pw_kernel(relu, res is not None),
        out_shape=jax.ShapeDtypeStruct((cout, n), _ACT_DTYPE),
        grid=(_cdiv(n, tm),),
        in_specs=in_specs,
        out_specs=pl.BlockSpec((cout, tm), lambda i: (0, i)),
        compiler_params=_compiler_params(),
    )(*args)


# ----------------------------------------------------------------------------
# Pallas kernel 2: fused tail (channels-first)
#   z = w3^T @ x + b3 + res            (last FNO layer, no relu)      (8, tm)
#   a = relu(fc1^T @ z + b1)           (stays in VMEM, never HBM)     (128, tm)
#   o = fc2^T @ a + b2                 (lane-dense scalar row)        (1, tm)
# ----------------------------------------------------------------------------
def _tail_kernel(x_ref, r_ref, w3T_ref, b3_ref, w1T_ref, b1_ref, w2T_ref, b2_ref,
                 o_ref):
    z = jnp.dot(w3T_ref[...], x_ref[...], preferred_element_type=jnp.float32)
    z = z + b3_ref[...] + r_ref[...]
    a = jnp.dot(w1T_ref[...], z, preferred_element_type=jnp.float32) + b1_ref[...]
    a = jnp.maximum(a, 0.0)
    y = jnp.dot(w2T_ref[...], a, preferred_element_type=jnp.float32) + b2_ref[...]
    o_ref[...] = y.astype(o_ref.dtype)


def fused_tail(x_cf, res_cf, w3, b3, fc1_w, fc1_b, fc2_w, fc2_b, tm_max=8192):
    """Fused (last 1x1 conv + residual) -> fc1 -> relu -> fc2; output (1, N)."""
    cin, n = x_cf.shape
    hidden = fc1_w.shape[1]
    tm = _choose_tm(n, tm_max)   # tm_max bounds the live (128, tm) fc1 intermediate

    return pl.pallas_call(
        _tail_kernel,
        out_shape=jax.ShapeDtypeStruct((1, n), jnp.float32),
        grid=(_cdiv(n, tm),),
        in_specs=[
            pl.BlockSpec((cin, tm), lambda i: (0, i)),        # h tile
            pl.BlockSpec((cin, tm), lambda i: (0, i)),        # spectral residual tile
            pl.BlockSpec((cin, cin), lambda i: (0, 0)),       # w3^T (8x8)
            pl.BlockSpec((cin, 1), lambda i: (0, 0)),         # b3
            pl.BlockSpec((hidden, cin), lambda i: (0, 0)),    # fc1^T (128x8)
            pl.BlockSpec((hidden, 1), lambda i: (0, 0)),      # fc1_b
            pl.BlockSpec((1, hidden), lambda i: (0, 0)),      # fc2^T (1x128)
            pl.BlockSpec((1, 1), lambda i: (0, 0)),           # fc2_b
        ],
        out_specs=pl.BlockSpec((1, tm), lambda i: (0, i)),    # lane-dense output row
        compiler_params=_compiler_params(),
    )(x_cf.astype(_ACT_DTYPE), res_cf.astype(_ACT_DTYPE),
      w3.T, b3.reshape(cin, 1), fc1_w.T, fc1_b.reshape(hidden, 1),
      fc2_w.T, fc2_b.reshape(1, 1))


# ----------------------------------------------------------------------------
# SpectralConv3d (FFT + mode mixing) -- plain JAX glue, channels-first:
# real-arithmetic einsums on pre-transposed (m,m,m,i,o) weights emit 'obxyz'
# directly, so no transpose is needed between the FFT path and the Pallas passes.
# ----------------------------------------------------------------------------
def spectral_conv3d(h_cf, corner_ws, modes):
    # TODO(synk): rfftn/irfftn have no Pallas TPU equivalent; the FFT and the
    # complex mode-mixing einsums stay in jnp (they dominate FLOPs anyway).
    m = modes
    Ci, B, X, Y, Z = h_cf.shape
    zr = Z // 2 + 1
    assert 2 * m <= X and 2 * m <= Y and m <= zr, "modes too large for grid"

    x_ft = jnp.fft.rfftn(h_cf.astype(jnp.float32), axes=(2, 3, 4))  # [Ci,B,X,Y,zr] c64

    def mix(block, w):                         # "ibxyz,xyzio->obxyz" in real arithmetic
        wr, wi = w
        br, bi = jnp.real(block), jnp.imag(block)

        def em(a, ww):
            return jnp.einsum("ibxyz,xyzio->obxyz", a, ww)

        return ((em(br, wr) - em(bi, wi))
                + 1j * (em(br, wi) + em(bi, wr))).astype(jnp.complex64)

    c_ll = mix(x_ft[:, :, :m, :m, :m], corner_ws[0])     # x-low , y-low
    c_hl = mix(x_ft[:, :, -m:, :m, :m], corner_ws[1])    # x-high, y-low
    c_lh = mix(x_ft[:, :, :m, -m:, :m], corner_ws[2])    # x-low , y-high
    c_hh = mix(x_ft[:, :, -m:, -m:, :m], corner_ws[3])   # x-high, y-high

    co = c_ll.shape[0]
    zero_y = jnp.zeros((co, B, m, Y - 2 * m, m), jnp.complex64)
    x_low = jnp.concatenate([c_ll, zero_y, c_lh], axis=3)
    x_high = jnp.concatenate([c_hl, zero_y, c_hh], axis=3)
    zero_x = jnp.zeros((co, B, X - 2 * m, Y, m), jnp.complex64)
    slab = jnp.concatenate([x_low, zero_x, x_high], axis=2)          # [co,B,X,Y,m]
    out_ft = jnp.pad(slab, ((0, 0), (0, 0), (0, 0), (0, 0), (0, zr - m)))
    return jnp.fft.irfftn(out_ft, s=(X, Y, Z), axes=(2, 3, 4)).astype(jnp.float32)


# ----------------------------------------------------------------------------
# Parameters (deterministic synthetic init, shapes per SimpleBlock3d __init__)
# ----------------------------------------------------------------------------
def init_params(key, in_ch, width, modes, fc1_hidden=128):
    keys = iter(jax.random.split(key, 64))

    def lin(cin, cout):
        w = jax.random.normal(next(keys), (cin, cout), jnp.float32) / jnp.sqrt(float(cin))
        b = jax.random.normal(next(keys), (cout,), jnp.float32) * 0.01
        return w, b

    params = {}
    params["fc0_w"], params["fc0_b"] = lin(in_ch, width)
    scale = 1.0 / (width * width)
    for l in range(4):
        corners = []
        for _ in range(4):  # weights1..weights4, stored pre-transposed (m,m,m,i,o) as (re, im)
            re = scale * jax.random.uniform(next(keys), (modes, modes, modes, width, width), jnp.float32)
            im = scale * jax.random.uniform(next(keys), (modes, modes, modes, width, width), jnp.float32)
            corners.append((re, im))
        params[f"spec{l}"] = tuple(corners)
        params[f"w{l}_w"], params[f"w{l}_b"] = lin(width, width)   # 1x1 conv == channel matmul
    params["fc1_w"], params["fc1_b"] = lin(width, fc1_hidden)
    params["fc2_w"], params["fc2_b"] = lin(fc1_hidden, 1)
    return params


# ----------------------------------------------------------------------------
# Net3d forward (Pallas hot path) and pure-JAX reference
# ----------------------------------------------------------------------------
def net3d_forward(params, x, t, modes, use_tanh=False):
    # Net3d.forward: transform t, then (vanilla path) ignore it.
    t = jnp.tanh(t) if use_tanh else t / 10.0
    del t  # unused when vanilla=True

    B, X, Y, Z, cin = x.shape
    n = B * X * Y * Z
    width = params["fc0_w"].shape[1]

    # Single channels-first transpose of the (smallest) raw input; everything
    # downstream (Pallas passes and FFT path) stays channels-first [C, ...].
    x_cf = jnp.transpose(x, (4, 0, 1, 2, 3)).reshape(cin, n)

    h = pointwise_linear(x_cf, params["fc0_w"], params["fc0_b"])        # [width, N]
    h_cf = h.reshape(width, B, X, Y, Z)

    for l in range(3):
        x1 = spectral_conv3d(h_cf, params[f"spec{l}"], modes)           # [width,B,X,Y,Z]
        h = pointwise_linear(
            h_cf.reshape(width, n),
            params[f"w{l}_w"], params[f"w{l}_b"],
            res=x1.reshape(width, n), relu=True)
        h_cf = h.reshape(width, B, X, Y, Z)

    # Last FNO layer (no relu) fused with fc1 -> relu -> fc2 in one kernel.
    x1 = spectral_conv3d(h_cf, params["spec3"], modes)
    out = fused_tail(
        h_cf.reshape(width, n), x1.reshape(width, n),
        params["w3_w"], params["w3_b"],
        params["fc1_w"], params["fc1_b"],
        params["fc2_w"], params["fc2_b"])
    return out.reshape(B, X, Y, Z)   # == x.squeeze(-1)


def _spectral_conv3d_ref(x, corner_ws, modes):
    """Original-formulation spectral conv (complex einsum + .at[].set), channels-last."""
    m = modes
    B, X, Y, Z, _ = x.shape
    x_ft = jnp.fft.rfftn(x, axes=(1, 2, 3))

    def to_ioxyz(w):
        wr, wi = w
        return jnp.transpose(wr + 1j * wi, (3, 4, 0, 1, 2)).astype(jnp.complex64)

    w1, w2, w3, w4 = (to_ioxyz(w) for w in corner_ws)
    co = w1.shape[1]
    out_ft = jnp.zeros(x_ft.shape[:-1] + (co,), jnp.complex64)

    def mul(block, w):
        return jnp.einsum("bxyzi,ioxyz->bxyzo", block, w)

    out_ft = out_ft.at[:, :m, :m, :m, :].set(mul(x_ft[:, :m, :m, :m, :], w1))
    out_ft = out_ft.at[:, -m:, :m, :m, :].set(mul(x_ft[:, -m:, :m, :m, :], w2))
    out_ft = out_ft.at[:, :m, -m:, :m, :].set(mul(x_ft[:, :m, -m:, :m, :], w3))
    out_ft = out_ft.at[:, -m:, -m:, :m, :].set(mul(x_ft[:, -m:, -m:, :m, :], w4))
    return jnp.fft.irfftn(out_ft, s=(X, Y, Z), axes=(1, 2, 3)).astype(jnp.float32)


def net3d_reference(params, x, t, modes, use_tanh=False):
    t = jnp.tanh(t) if use_tanh else t / 10.0
    del t
    h = x @ params["fc0_w"] + params["fc0_b"]
    for l in range(4):
        x1 = _spectral_conv3d_ref(h, params[f"spec{l}"], modes)
        x2 = h @ params[f"w{l}_w"] + params[f"w{l}_b"]
        h = x1 + x2
        if l < 3:
            h = jnp.maximum(h, 0.0)
    h = jnp.maximum(h @ params["fc1_w"] + params["fc1_b"], 0.0)
    h = h @ params["fc2_w"] + params["fc2_b"]
    return h[..., 0]


if __name__ == "__main__":
    key = jax.random.PRNGKey(0)
    kx, kt, kp = jax.random.split(key, 3)

    B, X, Y, Z = 2, 8, 8, 8
    in_ch, width, modes = 6, 8, 3

    x = jax.random.normal(kx, (B, X, Y, Z, in_ch), jnp.float32)
    t = jax.random.normal(kt, (B, 1), jnp.float32)
    params = init_params(kp, in_ch, width, modes)

    fwd = jax.jit(functools.partial(net3d_forward, modes=modes))
    out = jax.block_until_ready(fwd(params, x, t))
    assert out.shape == (B, X, Y, Z), out.shape

    ref = jax.block_until_ready(net3d_reference(params, x, t, modes))
    np.testing.assert_allclose(np.asarray(out), np.asarray(ref), rtol=1e-4, atol=1e-4)

    print("KERNEL_OK")
</pallas_src>

<mosaic_0001>
module attributes {stable_mosaic.version = 11 : i64} {
  func.func @kernel(%arg0: i32, %arg1: memref<6x512xf32, #tpu.memory_space<vmem>>, %arg2: memref<8x6xf32, #tpu.memory_space<vmem>>, %arg3: memref<8x1xf32, #tpu.memory_space<vmem>>, %arg4: memref<8x512xf32, #tpu.memory_space<vmem>>) attributes {dimension_semantics = [#tpu.dimension_semantics<parallel>], iteration_bounds = array<i64: 2>, scalar_prefetch = 0 : i64, scratch_operands = 0 : i64, tpu.core_type = #tpu.core_type<tc>, window_params = [{transform_indices = @transform_0, window_bounds = array<i64: 6, 512>}, {pipeline_mode = #tpu.pipeline_mode<synchronous>, transform_indices = @transform_1, window_bounds = array<i64: 8, 6>}, {pipeline_mode = #tpu.pipeline_mode<synchronous>, transform_indices = @transform_2, window_bounds = array<i64: 8, 1>}, {transform_indices = @transform_3, window_bounds = array<i64: 8, 512>}]} {
    %c0 = arith.constant 0 : index
    %c0_0 = arith.constant 0 : index
    %0 = vector.load %arg2[%c0, %c0_0] : memref<8x6xf32, #tpu.memory_space<vmem>>, vector<8x6xf32>
    %c0_1 = arith.constant 0 : index
    %c0_2 = arith.constant 0 : index
    %1 = vector.load %arg1[%c0_1, %c0_2] : memref<6x512xf32, #tpu.memory_space<vmem>>, vector<6x512xf32>
    %cst = arith.constant dense<0.000000e+00> : vector<8x512xf32>
    %2 = tpu.matmul %0, %1, %cst {dimension_numbers = #tpu.dot_dimension_numbers<[1], [0], [0], [1], [0, 0, 1, 1], [], []>} : vector<8x6xf32>, vector<6x512xf32>, vector<8x512xf32> -> vector<8x512xf32>
    %c0_3 = arith.constant 0 : index
    %c0_4 = arith.constant 0 : index
    %3 = vector.load %arg3[%c0_3, %c0_4] : memref<8x1xf32, #tpu.memory_space<vmem>>, vector<8x1xf32>
    %4 = vector.broadcast %3 : vector<8x1xf32> to vector<8x512xf32>
    %5 = arith.addf %2, %4 : vector<8x512xf32>
    %c0_5 = arith.constant 0 : index
    %c0_6 = arith.constant 0 : index
    %6 = vector.load %arg4[%c0_5, %c0_6] : memref<8x512xf32, #tpu.memory_space<vmem>>, vector<8x512xf32>
    tpu.vector_store %arg4[%c0_5, %c0_6], %5 {strides = array<i32>} : memref<8x512xf32, #tpu.memory_space<vmem>>, vector<8x512xf32>,
    return
  }
  func.func @transform_0(%arg0: i32) -> (i32, i32) {
    %c0_i32 = arith.constant 0 : i32
    %c0_i32_0 = arith.constant 0 : i32
    return %c0_i32, %arg0 : i32, i32
  }
  func.func @transform_1(%arg0: i32) -> (i32, i32) {
    %c0_i32 = arith.constant 0 : i32
    %c0_i32_0 = arith.constant 0 : i32
    %c0_i32_1 = arith.constant 0 : i32
    return %c0_i32, %c0_i32_0 : i32, i32
  }
  func.func @transform_2(%arg0: i32) -> (i32, i32) {
    %c0_i32 = arith.constant 0 : i32
    %c0_i32_0 = arith.constant 0 : i32
    %c0_i32_1 = arith.constant 0 : i32
    return %c0_i32, %c0_i32_0 : i32, i32
  }
  func.func @transform_3(%arg0: i32) -> (i32, i32) {
    %c0_i32 = arith.constant 0 : i32
    %c0_i32_0 = arith.constant 0 : i32
    return %c0_i32, %arg0 : i32, i32
  }
}

module attributes {stable_mosaic.version = 11 : i64} {
  func.func @kernel(%arg0: i32, %arg1: memref<8x512xf32, #tpu.memory_space<vmem>>, %arg2: memref<8x8xf32, #tpu.memory_space<vmem>>, %arg3: memref<8x1xf32, #tpu.memory_space<vmem>>, %arg4: memref<8x512xf32, #tpu.memory_space<vmem>>, %arg5: memref<8x512xf32, #tpu.memory_space<vmem>>) attributes {dimension_semantics = [#tpu.dimension_semantics<parallel>], iteration_bounds = array<i64: 2>, scalar_prefetch = 0 : i64, scratch_operands = 0 : i64, tpu.core_type = #tpu.core_type<tc>, window_params = [{transform_indices = @transform_0, window_bounds = array<i64: 8, 512>}, {pipeline_mode = #tpu.pipeline_mode<synchronous>, transform_indices = @transform_1, window_bounds = array<i64: 8, 8>}, {pipeline_mode = #tpu.pipeline_mode<synchronous>, transform_indices = @transform_2, window_bounds = array<i64: 8, 1>}, {transform_indices = @transform_3, window_bounds = array<i64: 8, 512>}, {transform_indices = @transform_4, window_bounds = array<i64: 8, 512>}]} {
    %c0 = arith.constant 0 : index
    %c0_0 = arith.constant 0 : index
    %0 = vector.load %arg2[%c0, %c0_0] : memref<8x8xf32, #tpu.memory_space<vmem>>, vector<8x8xf32>
    %c0_1 = arith.constant 0 : index
    %c0_2 = arith.constant 0 : index
    %1 = vector.load %arg1[%c0_1, %c0_2] : memref<8x512xf32, #tpu.memory_space<vmem>>, vector<8x512xf32>
    %cst = arith.constant dense<0.000000e+00> : vector<8x512xf32>
    %2 = tpu.matmul %0, %1, %cst {dimension_numbers = #tpu.dot_dimension_numbers<[1], [0], [0], [1], [0, 0, 1, 1], [], []>} : vector<8x8xf32>, vector<8x512xf32>, vector<8x512xf32> -> vector<8x512xf32>
    %c0_3 = arith.constant 0 : index
    %c0_4 = arith.constant 0 : index
    %3 = vector.load %arg3[%c0_3, %c0_4] : memref<8x1xf32, #tpu.memory_space<vmem>>, vector<8x1xf32>
    %4 = vector.broadcast %3 : vector<8x1xf32> to vector<8x512xf32>
    %5 = arith.addf %2, %4 : vector<8x512xf32>
    %c0_5 = arith.constant 0 : index
    %c0_6 = arith.constant 0 : index
    %6 = vector.load %arg4[%c0_5, %c0_6] : memref<8x512xf32, #tpu.memory_space<vmem>>, vector<8x512xf32>
    %7 = arith.addf %5, %6 : vector<8x512xf32>
    %cst_7 = arith.constant 0.000000e+00 : f32
    %8 = vector.broadcast %cst_7 : f32 to vector<8x512xf32>
    %9 = arith.maximumf %7, %8 : vector<8x512xf32>
    %c0_8 = arith.constant 0 : index
    %c0_9 = arith.constant 0 : index
    %10 = vector.load %arg5[%c0_8, %c0_9] : memref<8x512xf32, #tpu.memory_space<vmem>>, vector<8x512xf32>
    tpu.vector_store %arg5[%c0_8, %c0_9], %9 {strides = array<i32>} : memref<8x512xf32, #tpu.memory_space<vmem>>, vector<8x512xf32>,
    return
  }
  func.func @transform_0(%arg0: i32) -> (i32, i32) {
    %c0_i32 = arith.constant 0 : i32
    %c0_i32_0 = arith.constant 0 : i32
    return %c0_i32, %arg0 : i32, i32
  }
  func.func @transform_1(%arg0: i32) -> (i32, i32) {
    %c0_i32 = arith.constant 0 : i32
    %c0_i32_0 = arith.constant 0 : i32
    %c0_i32_1 = arith.constant 0 : i32
    return %c0_i32, %c0_i32_0 : i32, i32
  }
  func.func @transform_2(%arg0: i32) -> (i32, i32) {
    %c0_i32 = arith.constant 0 : i32
    %c0_i32_0 = arith.constant 0 : i32
    %c0_i32_1 = arith.constant 0 : i32
    return %c0_i32, %c0_i32_0 : i32, i32
  }
  func.func @transform_3(%arg0: i32) -> (i32, i32) {
    %c0_i32 = arith.constant 0 : i32
    %c0_i32_0 = arith.constant 0 : i32
    return %c0_i32, %arg0 : i32, i32
  }
  func.func @transform_4(%arg0: i32) -> (i32, i32) {
    %c0_i32 = arith.constant 0 : i32
    %c0_i32_0 = arith.constant 0 : i32
    return %c0_i32, %arg0 : i32, i32
  }
}

module attributes {stable_mosaic.version = 11 : i64} {
  func.func @_tail_kernel(%arg0: i32, %arg1: memref<8x512xf32, #tpu.memory_space<vmem>>, %arg2: memref<8x512xf32, #tpu.memory_space<vmem>>, %arg3: memref<8x8xf32, #tpu.memory_space<vmem>>, %arg4: memref<8x1xf32, #tpu.memory_space<vmem>>, %arg5: memref<128x8xf32, #tpu.memory_space<vmem>>, %arg6: memref<128x1xf32, #tpu.memory_space<vmem>>, %arg7: memref<1x128xf32, #tpu.memory_space<vmem>>, %arg8: memref<1x1xf32, #tpu.memory_space<vmem>>, %arg9: memref<1x512xf32, #tpu.memory_space<vmem>>) attributes {dimension_semantics = [#tpu.dimension_semantics<parallel>], iteration_bounds = array<i64: 2>, scalar_prefetch = 0 : i64, scratch_operands = 0 : i64, tpu.core_type = #tpu.core_type<tc>, window_params = [{transform_indices = @transform_0, window_bounds = array<i64: 8, 512>}, {transform_indices = @transform_1, window_bounds = array<i64: 8, 512>}, {pipeline_mode = #tpu.pipeline_mode<synchronous>, transform_indices = @transform_2, window_bounds = array<i64: 8, 8>}, {pipeline_mode = #tpu.pipeline_mode<synchronous>, transform_indices = @transform_3, window_bounds = array<i64: 8, 1>}, {pipeline_mode = #tpu.pipeline_mode<synchronous>, transform_indices = @transform_4, window_bounds = array<i64: 128, 8>}, {pipeline_mode = #tpu.pipeline_mode<synchronous>, transform_indices = @transform_5, window_bounds = array<i64: 128, 1>}, {pipeline_mode = #tpu.pipeline_mode<synchronous>, transform_indices = @transform_6, window_bounds = array<i64: 1, 128>}, {pipeline_mode = #tpu.pipeline_mode<synchronous>, transform_indices = @transform_7, window_bounds = array<i64: 1, 1>}, {transform_indices = @transform_8, window_bounds = array<i64: 1, 512>}]} {
    %c0 = arith.constant 0 : index
    %c0_0 = arith.constant 0 : index
    %0 = vector.load %arg3[%c0, %c0_0] : memref<8x8xf32, #tpu.memory_space<vmem>>, vector<8x8xf32>
    %c0_1 = arith.constant 0 : index
    %c0_2 = arith.constant 0 : index
    %1 = vector.load %arg1[%c0_1, %c0_2] : memref<8x512xf32, #tpu.memory_space<vmem>>, vector<8x512xf32>
    %cst = arith.constant dense<0.000000e+00> : vector<8x512xf32>
    %2 = tpu.matmul %0, %1, %cst {dimension_numbers = #tpu.dot_dimension_numbers<[1], [0], [0], [1], [0, 0, 1, 1], [], []>} : vector<8x8xf32>, vector<8x512xf32>, vector<8x512xf32> -> vector<8x512xf32>
    %c0_3 = arith.constant 0 : index
    %c0_4 = arith.constant 0 : index
    %3 = vector.load %arg4[%c0_3, %c0_4] : memref<8x1xf32, #tpu.memory_space<vmem>>, vector<8x1xf32>
    %4 = vector.broadcast %3 : vector<8x1xf32> to vector<8x512xf32>
    %5 = arith.addf %2, %4 : vector<8x512xf32>
    %c0_5 = arith.constant 0 : index
    %c0_6 = arith.constant 0 : index
    %6 = vector.load %arg2[%c0_5, %c0_6] : memref<8x512xf32, #tpu.memory_space<vmem>>, vector<8x512xf32>
    %7 = arith.addf %5, %6 : vector<8x512xf32>
    %c0_7 = arith.constant 0 : index
    %c0_8 = arith.constant 0 : index
    %8 = vector.load %arg5[%c0_7, %c0_8] : memref<128x8xf32, #tpu.memory_space<vmem>>, vector<128x8xf32>
    %cst_9 = arith.constant dense<0.000000e+00> : vector<128x512xf32>
    %9 = tpu.matmul %8, %7, %cst_9 {dimension_numbers = #tpu.dot_dimension_numbers<[1], [0], [0], [1], [0, 0, 1, 1], [], []>} : vector<128x8xf32>, vector<8x512xf32>, vector<128x512xf32> -> vector<128x512xf32>
    %c0_10 = arith.constant 0 : index
    %c0_11 = arith.constant 0 : index
    %10 = vector.load %arg6[%c0_10, %c0_11] : memref<128x1xf32, #tpu.memory_space<vmem>>, vector<128x1xf32>
    %11 = vector.broadcast %10 : vector<128x1xf32> to vector<128x512xf32>
    %12 = arith.addf %9, %11 : vector<128x512xf32>
    %cst_12 = arith.constant 0.000000e+00 : f32
    %13 = vector.broadcast %cst_12 : f32 to vector<128x512xf32>
    %14 = arith.maximumf %12, %13 : vector<128x512xf32>
    %c0_13 = arith.constant 0 : index
    %c0_14 = arith.constant 0 : index
    %15 = vector.load %arg7[%c0_13, %c0_14] : memref<1x128xf32, #tpu.memory_space<vmem>>, vector<1x128xf32>
    %cst_15 = arith.constant dense<0.000000e+00> : vector<1x512xf32>
    %16 = tpu.matmul %15, %14, %cst_15 {dimension_numbers = #tpu.dot_dimension_numbers<[1], [0], [0], [1], [0, 0, 1, 1], [], []>} : vector<1x128xf32>, vector<128x512xf32>, vector<1x512xf32> -> vector<1x512xf32>
    %c0_16 = arith.constant 0 : index
    %c0_17 = arith.constant 0 : index
    %17 = vector.load %arg8[%c0_16, %c0_17] : memref<1x1xf32, #tpu.memory_space<vmem>>, vector<1x1xf32>
    %18 = vector.broadcast %17 : vector<1x1xf32> to vector<1x512xf32>
    %19 = arith.addf %16, %18 : vector<1x512xf32>
    %c0_18 = arith.constant 0 : index
    %c0_19 = arith.constant 0 : index
    %20 = vector.load %arg9[%c0_18, %c0_19] : memref<1x512xf32, #tpu.memory_space<vmem>>, vector<1x512xf32>
    tpu.vector_store %arg9[%c0_18, %c0_19], %19 {strides = array<i32>} : memref<1x512xf32, #tpu.memory_space<vmem>>, vector<1x512xf32>,
    return
  }
  func.func @transform_0(%arg0: i32) -> (i32, i32) {
    %c0_i32 = arith.constant 0 : i32
    %c0_i32_0 = arith.constant 0 : i32
    return %c0_i32, %arg0 : i32, i32
  }
  func.func @transform_1(%arg0: i32) -> (i32, i32) {
    %c0_i32 = arith.constant 0 : i32
    %c0_i32_0 = arith.constant 0 : i32
    return %c0_i32, %arg0 : i32, i32
  }
  func.func @transform_2(%arg0: i32) -> (i32, i32) {
    %c0_i32 = arith.constant 0 : i32
    %c0_i32_0 = arith.constant 0 : i32
    %c0_i32_1 = arith.constant 0 : i32
    return %c0_i32, %c0_i32_0 : i32, i32
  }
  func.func @transform_3(%arg0: i32) -> (i32, i32) {
    %c0_i32 = arith.constant 0 : i32
    %c0_i32_0 = arith.constant 0 : i32
    %c0_i32_1 = arith.constant 0 : i32
    return %c0_i32, %c0_i32_0 : i32, i32
  }
  func.func @transform_4(%arg0: i32) -> (i32, i32) {
    %c0_i32 = arith.constant 0 : i32
    %c0_i32_0 = arith.constant 0 : i32
    %c0_i32_1 = arith.constant 0 : i32
    return %c0_i32, %c0_i32_0 : i32, i32
  }
  func.func @transform_5(%arg0: i32) -> (i32, i32) {
    %c0_i32 = arith.constant 0 : i32
    %c0_i32_0 = arith.constant 0 : i32
    %c0_i32_1 = arith.constant 0 : i32
    return %c0_i32, %c0_i32_0 : i32, i32
  }
  func.func @transform_6(%arg0: i32) -> (i32, i32) {
    %c0_i32 = arith.constant 0 : i32
    %c0_i32_0 = arith.constant 0 : i32
    %c0_i32_1 = arith.constant 0 : i32
    return %c0_i32, %c0_i32_0 : i32, i32
  }
  func.func @transform_7(%arg0: i32) -> (i32, i32) {
    %c0_i32 = arith.constant 0 : i32
    %c0_i32_0 = arith.constant 0 : i32
    %c0_i32_1 = arith.constant 0 : i32
    return %c0_i32, %c0_i32_0 : i32, i32
  }
  func.func @transform_8(%arg0: i32) -> (i32, i32) {
    %c0_i32 = arith.constant 0 : i32
    %c0_i32_0 = arith.constant 0 : i32
    return %c0_i32, %arg0 : i32, i32
  }
}

</mosaic_0001>

<bundles_post_ra>
// kernel: net3d_forward.5
= control target key start
LH: loop header
LB: loop body
LE: loop exit
PB: predicated region body
PF: predicated region fallthrough
CT: control target
= control target key end

     0   :  { %s400_s12 = smov 0   ;;  %s423_s0 = inlined_call_operand.vmem [shape: f32[6,1024], index: 0, kind: input, shape index: {}]   ;;  %s424_s1 = inlined_call_operand.vmem [shape: f32[8,6], index: 1, kind: input, shape index: {}]   ;;  %s425_s2 = inlined_call_operand.vmem [shape: f32[8,1], index: 2, kind: input, shape index: {}]   ;;  %s426_s3 = inlined_call_operand.vmem [shape: f32[8,1024], index: 3, kind: output, shape index: {}]  }
   0x1 LB: > { %s342_s13 = sadd.s32 4294967295, %s377_s12   ;;  %p346_p0 = scmp.ge.s32.totalorder %s377_s12, 1  ;;  %s377_s12 = sphi %s400_s12, %s13_s12  }
   0x2   : > { %p138_p1 = scmp.lt.s32.totalorder %s377_s12, 3 }
   0x4   : > { %p139_p2 = pnand %p346_p0, %p138_p1 }
   0x5   : > { %s347_s14 = sshll.u32 (!%p139_p2), %s342_s13, 2 }
   0x6   : > { %142 = sbr.rel (%p139_p2) target bundleno = 152 (0x98), region = 32  ;;  %p163_p3 = scmp.lt.s32.totalorder (!%p139_p2), %s347_s14, 7 }
   0xb   : > { %v179_v0 = vld [vmem:[%s425_s2] sm:$0xff]  ;;  %v379_v1 = vmov 0   ;;  %s428_s14 = smov (!%p163_p3, %s347_s14), 7  ;;  %vm189_vm0 = vcmask 1045504   ;;  %vm185_vm1 = vcmask 48128  }
   0xc   : > { %370 = vset.pattern.permute.xlu0 %v379_v1  ;;  %s348_s17 = sshll.u32 %s428_s14, 3  ;;  %v174_v2 = vld [vmem:[%s424_s1] sm:$0xff] }
   0xd   : > { %182 = vperm.xlu0 %370, %v179_v0   ;;  %s166_s20 = scalar_lea.vmem %s423_s0, %s348_s17  ;;  %s172_s25 = scalar_lea.vmem %s426_s3, %s348_s17 }
   0xe   : > { %v177_v3 = vld [vmem:[%s166_s20 + $0x10] sm:$0x3f]  ;;  %v178_v4 = vld [vmem:[%s166_s20 + $0x18] sm:$0x3f]  ;;  %v175_v5 = vld [vmem:[%s166_s20] sm:$0x3f] }
   0xf   : > { %355 = vmatpush.msk.msra.mxu2 %vm189_vm0, %v177_v3  ;;  %357 = vmatpush.msk.msra.mxu3 %vm189_vm0, %v178_v4  ;;  %v176_v6 = vld [vmem:[%s166_s20 + $0x8] sm:$0x3f] }
  0x10   : > { %356 = vmatmul.msk.f32.vlgmr.msra.gmra.mxu2 %vm185_vm1, %v174_v2  ;;  %358 = vmatmul.msk.f32.vlgmr.msra.gmra.mxu3 %vm185_vm1, %v174_v2 }
  0x11   : > { %351 = vmatpush.msk.msra.mxu0 %vm189_vm0, %v175_v5  ;;  %353 = vmatpush.msk.msra.mxu1 %vm189_vm0, %v176_v6 }
  0x12   : > { %352 = vmatmul.msk.f32.vlgmr.msra.gmra.mxu0 %vm185_vm1, %v174_v2  ;;  %354 = vmatmul.msk.f32.vlgmr.msra.gmra.mxu1 %vm185_vm1, %v174_v2 }
  0x7f   : > { %v183_v7 = vpop.permute.xlu0 %182 }
  0x8f   : > { %v219_v8 = vpop.f32.mrf.mxu0  ;;  %v239_v9 = vpop.f32.mrf.mxu1 }
  0x90   : > { %v220_v10 = vadd.f32 %v219_v8, %v183_v7  ;;  %v240_v11 = vadd.f32 %v239_v9, %v183_v7 }
  0x92   : > { %282 = vst [vmem:[%s172_s25] sm:$0xff] %v220_v10 }
  0x93   : > { %283 = vst [vmem:[%s172_s25 + $0x8] sm:$0xff] %v240_v11  ;;  %v259_v12 = vpop.f32.mrf.mxu2  ;;  %v279_v13 = vpop.f32.mrf.mxu3 }
  0x94   : > { %v260_v14 = vadd.f32 %v259_v12, %v183_v7  ;;  %v280_v15 = vadd.f32 %v279_v13, %v183_v7 }
  0x96   : > { %284 = vst [vmem:[%s172_s25 + $0x10] sm:$0xff] %v260_v14 }
  0x97   : > { %285 = vst [vmem:[%s172_s25 + $0x18] sm:$0xff] %v280_v15 }
  0x98 PF: > { %s13_s12 = sadd.s32 1, %s377_s12  }
  0x99   : > { %p10_p4 = scmp.ge.s32.totalorder %s13_s12, 4  }
  0x9b   :  { %12 = sbr.rel (!%p10_p4) target bundleno = 1 (0x1), region = 62 }

// kernel: reverse.8
= control target key start
LH: loop header
LB: loop body
LE: loop exit
PB: predicated region body
PF: predicated region fallthrough
CT: control target
= control target key end

     0   :  { %s584_s0 = inlined_call_operand.vmem [shape: f32[8,2,8,8,3], index: 0, kind: input, shape index: {}]   ;;  %s585_s1 = inlined_call_operand.vmem [shape: f32[8,2,8,8,3], index: 1, kind: output, shape index: {}]  }
   0x1   :  { %v192_v0 = vld [vmem:[%s584_s0 + $0x10] sm:$0xff]  ;;  %v193_v1 = vld [vmem:[%s584_s0 + $0x40] sm:$0xff]  ;;  %v207_v8 = vld [vmem:[%s584_s0 + $0x28] sm:$0xff] }
   0x2   :  { %v195_v2 = vld [vmem:[%s584_s0 + $0x70] sm:$0xff]  ;;  %4 = vst [vmem:[%s585_s1] sm:$0xff] %v192_v0  ;;  %v197_v3 = vld [vmem:[%s584_s0 + $0xa0] sm:$0xff]  ;;  %v209_v9 = vld [vmem:[%s584_s0 + $0x58] sm:$0xff] }
   0x3   :  { %194 = vst [vmem:[%s585_s1 + $0x30] sm:$0xff] %v193_v1  ;;  %v199_v4 = vld [vmem:[%s584_s0 + $0xd0] sm:$0xff]  ;;  %v201_v5 = vld [vmem:[%s584_s0 + $0x100] sm:$0xff]  ;;  %v211_v10 = vld [vmem:[%s584_s0 + $0x88] sm:$0xff] }
   0x4   :  { %196 = vst [vmem:[%s585_s1 + $0x60] sm:$0xff] %v195_v2  ;;  %v203_v6 = vld [vmem:[%s584_s0 + $0x130] sm:$0xff]  ;;  %v205_v7 = vld [vmem:[%s584_s0 + $0x160] sm:$0xff]  ;;  %v213_v11 = vld [vmem:[%s584_s0 + $0xb8] sm:$0xff] }
   0x5   :  { %198 = vst [vmem:[%s585_s1 + $0x90] sm:$0xff] %v197_v3  ;;  %v215_v12 = vld [vmem:[%s584_s0 + $0xe8] sm:$0xff]  ;;  %v217_v13 = vld [vmem:[%s584_s0 + $0x118] sm:$0xff]  ;;  %v239_v24 = vld [vmem:[%s584_s0 + $0x20] sm:$0xff] }
   0x6   :  { %200 = vst [vmem:[%s585_s1 + $0xc0] sm:$0xff] %v199_v4  ;;  %v219_v14 = vld [vmem:[%s584_s0 + $0x148] sm:$0xff]  ;;  %v221_v15 = vld [vmem:[%s584_s0 + $0x178] sm:$0xff]  ;;  %v241_v25 = vld [vmem:[%s584_s0 + $0x50] sm:$0xff] }
   0x7   :  { %202 = vst [vmem:[%s585_s1 + $0xf0] sm:$0xff] %v201_v5  ;;  %v223_v16 = vld [vmem:[%s584_s0 + $0x8] sm:$0xff]  ;;  %v225_v17 = vld [vmem:[%s584_s0 + $0x38] sm:$0xff]  ;;  %v243_v26 = vld [vmem:[%s584_s0 + $0x80] sm:$0xff] }
   0x8   :  { %204 = vst [vmem:[%s585_s1 + $0x120] sm:$0xff] %v203_v6  ;;  %v227_v18 = vld [vmem:[%s584_s0 + $0x68] sm:$0xff]  ;;  %v229_v19 = vld [vmem:[%s584_s0 + $0x98] sm:$0xff]  ;;  %v245_v27 = vld [vmem:[%s584_s0 + $0xb0] sm:$0xff] }
   0x9   :  { %206 = vst [vmem:[%s585_s1 + $0x150] sm:$0xff] %v205_v7  ;;  %v231_v20 = vld [vmem:[%s584_s0 + $0xc8] sm:$0xff]  ;;  %v233_v21 = vld [vmem:[%s584_s0 + $0xf8] sm:$0xff]  ;;  %v247_v28 = vld [vmem:[%s584_s0 + $0xe0] sm:$0xff] }
   0xa   :  { %208 = vst [vmem:[%s585_s1 + $0x18] sm:$0xff] %v207_v8  ;;  %v235_v22 = vld [vmem:[%s584_s0 + $0x128] sm:$0xff]  ;;  %v237_v23 = vld [vmem:[%s584_s0 + $0x158] sm:$0xff]  ;;  %v249_v29 = vld [vmem:[%s584_s0 + $0x110] sm:$0xff] }
   0xb   :  { %210 = vst [vmem:[%s585_s1 + $0x48] sm:$0xff] %v209_v9  ;;  %v251_v30 = vld [vmem:[%s584_s0 + $0x140] sm:$0xff]  ;;  %v253_v31 = vld [vmem:[%s584_s0 + $0x170] sm:$0xff]  ;;  %v270_v40 = vld [vmem:[%s584_s0 + $0x18] sm:$0xff] }
   0xc   :  { %212 = vst [vmem:[%s585_s1 + $0x78] sm:$0xff] %v211_v10  ;;  %v129_v32 = vld [vmem:[%s584_s0] sm:$0xff]  ;;  %v256_v33 = vld [vmem:[%s584_s0 + $0x30] sm:$0xff]  ;;  %v272_v41 = vld [vmem:[%s584_s0 + $0x48] sm:$0xff] }
   0xd   :  { %214 = vst [vmem:[%s585_s1 + $0xa8] sm:$0xff] %v213_v11  ;;  %v258_v34 = vld [vmem:[%s584_s0 + $0x60] sm:$0xff]  ;;  %v260_v35 = vld [vmem:[%s584_s0 + $0x90] sm:$0xff]  ;;  %v274_v42 = vld [vmem:[%s584_s0 + $0x78] sm:$0xff] }
   0xe   :  { %216 = vst [vmem:[%s585_s1 + $0xd8] sm:$0xff] %v215_v12  ;;  %v262_v36 = vld [vmem:[%s584_s0 + $0xc0] sm:$0xff]  ;;  %v264_v37 = vld [vmem:[%s584_s0 + $0xf0] sm:$0xff]  ;;  %v276_v43 = vld [vmem:[%s584_s0 + $0xa8] sm:$0xff] }
   0xf   :  { %218 = vst [vmem:[%s585_s1 + $0x108] sm:$0xff] %v217_v13  ;;  %v266_v38 = vld [vmem:[%s584_s0 + $0x120] sm:$0xff]  ;;  %v268_v39 = vld [vmem:[%s584_s0 + $0x150] sm:$0xff]  ;;  %v278_v44 = vld [vmem:[%s584_s0 + $0xd8] sm:$0xff] }
  0x10   :  { %220 = vst [vmem:[%s585_s1 + $0x138] sm:$0xff] %v219_v14  ;;  %v280_v45 = vld [vmem:[%s584_s0 + $0x108] sm:$0xff]  ;;  %v282_v46 = vld [vmem:[%s584_s0 + $0x138] sm:$0xff] }
  0x11   :  { %222 = vst [vmem:[%s585_s1 + $0x168] sm:$0xff] %v221_v15  ;;  %v284_v47 = vld [vmem:[%s584_s0 + $0x168] sm:$0xff] }
  0x12   :  { %224 = vst [vmem:[%s585_s1 + $0x8] sm:$0xff] %v223_v16 }
  0x13   :  { %226 = vst [vmem:[%s585_s1 + $0x38] sm:$0xff] %v225_v17 }
  0x14   :  { %228 = vst [vmem:[%s585_s1 + $0x68] sm:$0xff] %v227_v18 }
  0x15   :  { %230 = vst [vmem:[%s585_s1 + $0x98] sm:$0xff] %v229_v19 }
  0x16   :  { %232 = vst [vmem:[%s585_s1 + $0xc8] sm:$0xff] %v231_v20 }
  0x17   :  { %234 = vst [vmem:[%s585_s1 + $0xf8] sm:$0xff] %v233_v21 }
  0x18   :  { %236 = vst [vmem:[%s585_s1 + $0x128] sm:$0xff] %v235_v22 }
  0x19   :  { %238 = vst [vmem:[%s585_s1 + $0x158] sm:$0xff] %v237_v23 }
  0x1a   :  { %240 = vst [vmem:[%s585_s1 + $0x20] sm:$0xff] %v239_v24 }
  0x1b   :  { %242 = vst [vmem:[%s585_s1 + $0x50] sm:$0xff] %v241_v25 }
  0x1c   :  { %244 = vst [vmem:[%s585_s1 + $0x80] sm:$0xff] %v243_v26 }
  0x1d   :  { %246 = vst [vmem:[%s585_s1 + $0xb0] sm:$0xff] %v245_v27 }
  0x1e   :  { %248 = vst [vmem:[%s585_s1 + $0xe0] sm:$0xff] %v247_v28 }
  0x1f   :  { %250 = vst [vmem:[%s585_s1 + $0x110] sm:$0xff] %v249_v29 }
  0x20   :  { %252 = vst [vmem:[%s585_s1 + $0x140] sm:$0xff] %v251_v30 }
  0x21   :  { %254 = vst [vmem:[%s585_s1 + $0x170] sm:$0xff] %v253_v31 }
  0x22   :  { %255 = vst [vmem:[%s585_s1 + $0x10] sm:$0xff] %v129_v32 }
  0x23   :  { %257 = vst [vmem:[%s585_s1 + $0x40] sm:$0xff] %v256_v33 }
  0x24   :  { %259 = vst [vmem:[%s585_s1 + $0x70] sm:$0xff] %v258_v34 }
  0x25   :  { %261 = vst [vmem:[%s585_s1 + $0xa0] sm:$0xff] %v260_v35 }
  0x26   :  { %263 = vst [vmem:[%s585_s1 + $0xd0] sm:$0xff] %v262_v36 }
  0x27   :  { %265 = vst [vmem:[%s585_s1 + $0x100] sm:$0xff] %v264_v37 }
  0x28   :  { %267 = vst [vmem:[%s585_s1 + $0x130] sm:$0xff] %v266_v38 }
  0x29   :  { %269 = vst [vmem:[%s585_s1 + $0x160] sm:$0xff] %v268_v39 }
  0x2a   :  { %271 = vst [vmem:[%s585_s1 + $0x28] sm:$0xff] %v270_v40 }
  0x2b   :  { %273 = vst [vmem:[%s585_s1 + $0x58] sm:$0xff] %v272_v41 }
  0x2c   :  { %275 = vst [vmem:[%s585_s1 + $0x88] sm:$0xff] %v274_v42 }
  0x2d   :  { %277 = vst [vmem:[%s585_s1 + $0xb8] sm:$0xff] %v276_v43 }
  0x2e   :  { %279 = vst [vmem:[%s585_s1 + $0xe8] sm:$0xff] %v278_v44 }
  0x2f   :  { %281 = vst [vmem:[%s585_s1 + $0x118] sm:$0xff] %v280_v45 }
  0x30   :  { %283 = vst [vmem:[%s585_s1 + $0x148] sm:$0xff] %v282_v46 }
  0x31   :  { %285 = vst [vmem:[%s585_s1 + $0x178] sm:$0xff] %v284_v47 }

// kernel: net3d_forward.6
= control target key start
LH: loop header
LB: loop body
LE: loop exit
PB: predicated region body
PF: predicated region fallthrough
CT: control target
= control target key end

     0   :  { %s463_s15 = smov 0   ;;  %s489_s0 = inlined_call_operand.vmem [shape: f32[8,1024], index: 0, kind: input, shape index: {}]   ;;  %s490_s1 = inlined_call_operand.vmem [shape: f32[8,8], index: 1, kind: input, shape index: {}]   ;;  %s491_s2 = inlined_call_operand.vmem [shape: f32[8,1], index: 2, kind: input, shape index: {}]   ;;  %s492_s3 = inlined_call_operand.vmem [shape: f32[8,1024], index: 3, kind: input, shape index: {}]   ;;  %s493_s4 = inlined_call_operand.vmem [shape: f32[8,1024], index: 4, kind: output, shape index: {}]  }
   0x1 LB: > { %s402_s16 = sadd.s32 4294967295, %s435_s15   ;;  %p406_p0 = scmp.ge.s32.totalorder %s435_s15, 1  ;;  %s435_s15 = sphi %s463_s15, %s14_s15  }
   0x2   : > { %p174_p1 = scmp.lt.s32.totalorder %s435_s15, 3 }
   0x4   : > { %p175_p2 = pnand %p406_p0, %p174_p1 }
   0x5   : > { %s407_s17 = sshll.u32 (!%p175_p2), %s402_s16, 2 }
   0x6   : > { %178 = sbr.rel (%p175_p2) target bundleno = 156 (0x9c), region = 36  ;;  %p206_p3 = scmp.lt.s32.totalorder (!%p175_p2), %s407_s17, 7 }
   0xb   : > { %v228_v0 = vld [vmem:[%s491_s2] sm:$0xff]  ;;  %v437_v1 = vmov 0   ;;  %s495_s17 = smov (!%p206_p3, %s407_s17), 7  ;;  %vm234_vm0 = vcmask 64512  }
   0xc   : > { %428 = vset.pattern.permute.xlu0 %v437_v1  ;;  %s408_s20 = sshll.u32 %s495_s17, 3  ;;  %v223_v2 = vld [vmem:[%s490_s1] sm:$0xff] }
   0xd   : > { %231 = vperm.xlu0 %428, %v228_v0   ;;  %s209_s23 = scalar_lea.vmem %s489_s0, %s408_s20  ;;  %s215_s28 = scalar_lea.vmem %s492_s3, %s408_s20 }
   0xe   : > { %v226_v3 = vld [vmem:[%s209_s23 + $0x10] sm:$0xff]  ;;  %v227_v4 = vld [vmem:[%s209_s23 + $0x18] sm:$0xff]  ;;  %v224_v5 = vld [vmem:[%s209_s23] sm:$0xff]  ;;  %s221_s5 = scalar_lea.vmem %s493_s4, %s408_s20 }
   0xf   : > { %293 = vmatpush.msra.mxu2 %v226_v3  ;;  %313 = vmatpush.msra.mxu3 %v227_v4  ;;  %v225_v6 = vld [vmem:[%s209_s23 + $0x8] sm:$0xff]  ;;  %v318_v9 = vld [vmem:[%s215_s28] sm:$0xff]  ;;  %v320_v17 = vld [vmem:[%s215_s28 + $0x10] sm:$0xff] }
  0x10   : > { %415 = vmatmul.msk.f32.vlgmr.msra.gmra.mxu2 %vm234_vm0, %v223_v2  ;;  %416 = vmatmul.msk.f32.vlgmr.msra.gmra.mxu3 %vm234_vm0, %v223_v2  ;;  %v319_v11 = vld [vmem:[%s215_s28 + $0x8] sm:$0xff]  ;;  %v321_v19 = vld [vmem:[%s215_s28 + $0x18] sm:$0xff] }
  0x11   : > { %253 = vmatpush.msra.mxu0 %v224_v5  ;;  %273 = vmatpush.msra.mxu1 %v225_v6 }
  0x12   : > { %413 = vmatmul.msk.f32.vlgmr.msra.gmra.mxu0 %vm234_vm0, %v223_v2  ;;  %414 = vmatmul.msk.f32.vlgmr.msra.gmra.mxu1 %vm234_vm0, %v223_v2 }
  0x7f   : > { %v232_v7 = vpop.permute.xlu0 %231 }
  0x8f   : > { %v255_v8 = vpop.f32.mrf.mxu0  ;;  %v275_v10 = vpop.f32.mrf.mxu1 }
  0x90   : > { %v256_v12 = vadd.f32 %v255_v8, %v232_v7  ;;  %v276_v13 = vadd.f32 %v275_v10, %v232_v7 }
  0x92   : > { %v322_v14 = vadd.f32 %v318_v9, %v256_v12  ;;  %v323_v15 = vadd.f32 %v319_v11, %v276_v13 }
  0x93   : > { %v295_v16 = vpop.f32.mrf.mxu2  ;;  %v315_v18 = vpop.f32.mrf.mxu3 }
  0x94   : > { %v326_v20 = vmax.f32 %v322_v14, 0.0  ;;  %v327_v21 = vmax.f32 %v323_v15, 0.0  ;;  %v296_v22 = vadd.f32 %v295_v16, %v232_v7  ;;  %v316_v23 = vadd.f32 %v315_v18, %v232_v7 }
  0x96   : > { %330 = vst [vmem:[%s221_s5] sm:$0xff] %v326_v20  ;;  %v324_v24 = vadd.f32 %v320_v17, %v296_v22  ;;  %v325_v25 = vadd.f32 %v321_v19, %v316_v23 }
  0x97   : > { %331 = vst [vmem:[%s221_s5 + $0x8] sm:$0xff] %v327_v21 }
  0x98   : > { %v328_v26 = vmax.f32 %v324_v24, 0.0  ;;  %v329_v27 = vmax.f32 %v325_v25, 0.0 }
  0x9a   : > { %332 = vst [vmem:[%s221_s5 + $0x10] sm:$0xff] %v328_v26 }
  0x9b   : > { %333 = vst [vmem:[%s221_s5 + $0x18] sm:$0xff] %v329_v27 }
  0x9c PF: > { %s14_s15 = sadd.s32 1, %s435_s15  }
  0x9d   : > { %p11_p4 = scmp.ge.s32.totalorder %s14_s15, 4  }
  0x9f   :  { %13 = sbr.rel (!%p11_p4) target bundleno = 1 (0x1), region = 69 }

// kernel: net3d_forward.9
= control target key start
LH: loop header
LB: loop body
LE: loop exit
PB: predicated region body
PF: predicated region fallthrough
CT: control target
= control target key end

     0   :  { %s1236_s29 = smov 0   ;;  %s1674_s0 = inlined_call_operand.vmem [shape: f32[8,1024], index: 0, kind: input, shape index: {}]   ;;  %s1675_s1 = inlined_call_operand.vmem [shape: f32[8,1024], index: 1, kind: input, shape index: {}]   ;;  %s1676_s2 = inlined_call_operand.vmem [shape: f32[8,8], index: 2, kind: input, shape index: {}]   ;;  %s1677_s3 = inlined_call_operand.vmem [shape: f32[8,1], index: 3, kind: input, shape index: {}]   ;;  %s1678_s4 = inlined_call_operand.vmem [shape: f32[128,8], index: 4, kind: input, shape index: {}]   ;;  %s1679_s5 = inlined_call_operand.vmem [shape: f32[128,1], index: 5, kind: input, shape index: {}]   ;;  %s1680_s6 = inlined_call_operand.vmem [shape: f32[1,128], index: 6, kind: input, shape index: {}]   ;;  %s1681_s7 = inlined_call_operand.<no memory space> [shape: f32[1,1], index: 7, kind: input, shape index: {}]   ;;  %s1682_s8 = inlined_call_operand.vmem [shape: f32[1,1024], index: 8, kind: output, shape index: {}]  }
   0x1   :  { %v13_v0 = vstv %s1681_s7 }
   0x2   :  { %14 = vst [vmem:[#allocation2] sm:$0x1] %v13_v0 }
   0x3 LB: > { %s1087_s30 = sadd.s32 4294967295, %s1185_s29   ;;  %p1091_p0 = scmp.ge.s32.totalorder %s1185_s29, 1  ;;  %s1185_s29 = sphi %s1236_s29, %s20_s29  }
   0x4   : > { %p276_p1 = scmp.lt.s32.totalorder %s1185_s29, 3 }
   0x6   : > { %p277_p2 = pnand %p1091_p0, %p276_p1 }
   0x8   : > { %280 = sbr.rel (%p277_p2) target bundleno = 586 (0x24a), region = 52 }
   0xd   : > { %v336_v1 = vld [vmem:[%s1677_s3] sm:$0xff]  ;;  %s1092_s7 = sshll.u32 %s1087_s30, 2  ;;  %v1187_v2 = vmov 0   ;;  %vm342_vm0 = vcmask 64512   ;;  %v465_v8 = vld [vmem:[%s1679_s5 + $0x78] sm:$0xff]  ;;  %v460_v9 = vld [vmem:[%s1679_s5 + $0x50] sm:$0xff] }
   0xe   : > { %1176 = vset.pattern.permute.xlu0 %v1187_v2  ;;  %p315_p3 = scmp.lt.s32.totalorder %s1092_s7, 7  ;;  %1177 = vset.pattern.permute.xlu1 %v1187_v2  ;;  %v331_v3 = vld [vmem:[%s1676_s2] sm:$0xff]  ;;  %v457_v10 = vld [vmem:[%s1679_s5 + $0x38] sm:$0xff]  ;;  %v451_v12 = vld [vmem:[%s1679_s5 + $0x8] sm:$0xff]  ;;  %vm1013_vm1 = vcmask 1040384   ;;  %vm1015_vm2 = vcmask 1042434  }
   0xf   : > { %339 = vperm.xlu0 %1176, %v336_v1   ;;  %1178 = vset.pattern.permute.xlu2 %v1187_v2  ;;  %v454_v11 = vld [vmem:[%s1679_s5 + $0x20] sm:$0xff]  ;;  %v464_v13 = vld [vmem:[%s1679_s5 + $0x70] sm:$0xff]  ;;  %v463_v14 = vld [vmem:[%s1679_s5 + $0x68] sm:$0xff]  ;;  %vm1017_vm3 = vcmask 1041408  }
  0x10   : > { %s1716_s7 = smov (!%p315_p3, %s1092_s7), 7  ;;  %538 = vperm.xlu1 %1177, %v464_v13   ;;  %v459_v15 = vld [vmem:[%s1679_s5 + $0x48] sm:$0xff]  ;;  %v456_v16 = vld [vmem:[%s1679_s5 + $0x30] sm:$0xff]  ;;  %v453_v17 = vld [vmem:[%s1679_s5 + $0x18] sm:$0xff] }
  0x11   : > { %s1093_s11 = sshll.u32 %s1716_s7, 3  ;;  %v450_v18 = vld [vmem:[%s1679_s5] sm:$0xff]  ;;  %v435_v38 = vld [vmem:[%s1678_s4 + $0x8] sm:$0xff]  ;;  %v461_v39 = vld [vmem:[%s1679_s5 + $0x58] sm:$0xff]  ;;  %s329_s25 = scalar_lea.vmem %s1682_s8, %s1716_s7 }
  0x12   : > { %s318_s14 = scalar_lea.vmem %s1674_s0, %s1093_s11  ;;  %s324_s19 = scalar_lea.vmem %s1675_s1, %s1093_s11  ;;  %v434_v28 = vld [vmem:[%s1678_s4] sm:$0xff]  ;;  %v436_v40 = vld [vmem:[%s1678_s4 + $0x10] sm:$0xff]  ;;  %v437_v42 = vld [vmem:[%s1678_s4 + $0x18] sm:$0xff] }
  0x13   : > { %v332_v4 = vld [vmem:[%s318_s14] sm:$0xff]  ;;  %v333_v5 = vld [vmem:[%s318_s14 + $0x8] sm:$0xff]  ;;  %v334_v6 = vld [vmem:[%s318_s14 + $0x10] sm:$0xff] }
  0x14   : > { %361 = vmatpush.msra.mxu0 %v332_v4  ;;  %381 = vmatpush.msra.mxu1 %v333_v5  ;;  %v335_v7 = vld [vmem:[%s318_s14 + $0x18] sm:$0xff]  ;;  %v426_v22 = vld [vmem:[%s324_s19] sm:$0xff]  ;;  %v427_v23 = vld [vmem:[%s324_s19 + $0x8] sm:$0xff] }
  0x15   : > { %401 = vmatpush.msra.mxu2 %v334_v6  ;;  %421 = vmatpush.msra.mxu3 %v335_v7  ;;  %v462_v29 = vld [vmem:[%s1679_s5 + $0x60] sm:$0xff]  ;;  %v428_v31 = vld [vmem:[%s324_s19 + $0x10] sm:$0xff]  ;;  %v429_v34 = vld [vmem:[%s324_s19 + $0x18] sm:$0xff] }
  0x16   : > { %1097 = vmatmul.msk.f32.vlgmr.msra.gmra.mxu0 %vm342_vm0, %v331_v3  ;;  %1098 = vmatmul.msk.f32.vlgmr.msra.gmra.mxu1 %vm342_vm0, %v331_v3  ;;  %v458_v41 = vld [vmem:[%s1679_s5 + $0x40] sm:$0xff]  ;;  %v455_v43 = vld [vmem:[%s1679_s5 + $0x28] sm:$0xff]  ;;  %v452_v45 = vld [vmem:[%s1679_s5 + $0x10] sm:$0xff] }
  0x17   : > { %1099 = vmatmul.msk.f32.vlgmr.msra.gmra.mxu2 %vm342_vm0, %v331_v3  ;;  %1100 = vmatmul.msk.f32.vlgmr.msra.gmra.mxu3 %vm342_vm0, %v331_v3  ;;  %v438_v44 = vld [vmem:[%s1678_s4 + $0x20] sm:$0xff]  ;;  %v439_v46 = vld [vmem:[%s1678_s4 + $0x28] sm:$0xff]  ;;  %v440_v47 = vld [vmem:[%s1678_s4 + $0x30] sm:$0xff] }
  0x18   : > { %543 = vperm.xlu0 %1176, %v465_v8   ;;  %533 = vperm.xlu1 %1177, %v463_v14   ;;  %v441_v48 = vld [vmem:[%s1678_s4 + $0x38] sm:$0xff]  ;;  %v442_v49 = vld [vmem:[%s1678_s4 + $0x40] sm:$0xff]  ;;  %v443_v50 = vld [vmem:[%s1678_s4 + $0x48] sm:$0xff] }
  0x19   : > { %528 = vperm.xlu2 %1178, %v462_v29   ;;  %v444_v51 = vld [vmem:[%s1678_s4 + $0x50] sm:$0xff]  ;;  %v445_v52 = vld [vmem:[%s1678_s4 + $0x58] sm:$0xff]  ;;  %v446_v53 = vld [vmem:[%s1678_s4 + $0x60] sm:$0xff] }
  0x1a   : > { %v447_v54 = vld [vmem:[%s1678_s4 + $0x68] sm:$0xff]  ;;  %v448_v55 = vld [vmem:[%s1678_s4 + $0x70] sm:$0xff]  ;;  %v449_v56 = vld [vmem:[%s1678_s4 + $0x78] sm:$0xff] }
  0x1b   : > { %v919_v59 = vld [vmem:[#allocation2] sm:$0x1] }
  0x20   : > { %518 = vperm.xlu0 %1176, %v460_v9   ;;  %513 = vperm.xlu1 %1177, %v459_v15  }
  0x21   : > { %523 = vperm.xlu2 %1178, %v461_v39  }
  0x28   : > { %503 = vperm.xlu0 %1176, %v457_v10   ;;  %498 = vperm.xlu1 %1177, %v456_v16  }
  0x29   : > { %508 = vperm.xlu2 %1178, %v458_v41  }
  0x30   : > { %488 = vperm.xlu0 %1176, %v454_v11   ;;  %483 = vperm.xlu1 %1177, %v453_v17  }
  0x31   : > { %493 = vperm.xlu2 %1178, %v455_v43  }
  0x38   : > { %473 = vperm.xlu0 %1176, %v451_v12   ;;  %468 = vperm.xlu1 %1177, %v450_v18  }
  0x39   : > { %478 = vperm.xlu2 %1178, %v452_v45  }
  0x41   : > { %922 = vperm.xlu2 %1178, %v919_v59  }
  0x73   : > { %v1517_v45 = vpop.permute.xlu2 %528 }
  0x81   : > { %v340_v19 = vpop.permute.xlu0 %339 }
  0x93   : > { %v363_v20 = vpop.f32.mrf.mxu0  ;;  %v383_v21 = vpop.f32.mrf.mxu1 }
  0x94   : > { %v364_v24 = vadd.f32 %v363_v20, %v340_v19  ;;  %v384_v25 = vadd.f32 %v383_v21, %v340_v19 }
  0x96   : > { %v430_v26 = vadd.f32 %v426_v22, %v364_v24  ;;  %v431_v27 = vadd.f32 %v427_v23, %v384_v25 }
  0x98   : > { %609 = vmatpush.msrb.mxu0 %v430_v26  ;;  %674 = vmatpush.msrb.mxu1 %v431_v27 }
  0x99   : > { %1101 = vmatmul.msk.f32.vlgmr.msrb.gmra.mxu0 %vm342_vm0, %v434_v28  ;;  %1117 = vmatmul.msk.f32.vlgmr.msrb.gmra.mxu1 %vm342_vm0, %v434_v28 }
  0x9a   : > { %v403_v30 = vpop.f32.mrf.mxu2  ;;  %v423_v33 = vpop.f32.mrf.mxu3 }
  0x9b   : > { %v404_v32 = vadd.f32 %v403_v30, %v340_v19  ;;  %v424_v35 = vadd.f32 %v423_v33, %v340_v19 }
  0x9d   : > { %v432_v36 = vadd.f32 %v428_v31, %v404_v32  ;;  %v433_v37 = vadd.f32 %v429_v34, %v424_v35 }
  0x9f   : > { %739 = vmatpush.msrb.mxu2 %v432_v36  ;;  %804 = vmatpush.msrb.mxu3 %v433_v37 }
  0xa0   : > { %1133 = vmatmul.msk.f32.vlgmr.msrb.gmra.mxu2 %vm342_vm0, %v434_v28  ;;  %1149 = vmatmul.msk.f32.vlgmr.msrb.gmra.mxu3 %vm342_vm0, %v434_v28 }
  0xa1   : > { %1102 = vmatmul.msk.f32.gmra.mxu0 %vm342_vm0, %v435_v38  ;;  %1118 = vmatmul.msk.f32.gmra.mxu1 %vm342_vm0, %v435_v38 }
  0xa8   : > { %1134 = vmatmul.msk.f32.gmra.mxu2 %vm342_vm0, %v435_v38  ;;  %1150 = vmatmul.msk.f32.gmra.mxu3 %vm342_vm0, %v435_v38 }
  0xa9   : > { %1103 = vmatmul.msk.f32.gmra.mxu0 %vm342_vm0, %v436_v40  ;;  %1119 = vmatmul.msk.f32.gmra.mxu1 %vm342_vm0, %v436_v40 }
  0xb0   : > { %1135 = vmatmul.msk.f32.gmra.mxu2 %vm342_vm0, %v436_v40  ;;  %1151 = vmatmul.msk.f32.gmra.mxu3 %vm342_vm0, %v436_v40 }
  0xb1   : > { %1104 = vmatmul.msk.f32.gmra.mxu0 %vm342_vm0, %v437_v42  ;;  %1120 = vmatmul.msk.f32.gmra.mxu1 %vm342_vm0, %v437_v42 }
  0xb8   : > { %1136 = vmatmul.msk.f32.gmra.mxu2 %vm342_vm0, %v437_v42  ;;  %1152 = vmatmul.msk.f32.gmra.mxu3 %vm342_vm0, %v437_v42  ;;  %v1511_v42 = vpop.permute.xlu1 %538 }
  0xb9   : > { %1105 = vmatmul.msk.f32.gmra.mxu0 %vm342_vm0, %v438_v44  ;;  %1121 = vmatmul.msk.f32.gmra.mxu1 %vm342_vm0, %v438_v44 }
  0xc0   : > { %1137 = vmatmul.msk.f32.gmra.mxu2 %vm342_vm0, %v438_v44  ;;  %1153 = vmatmul.msk.f32.gmra.mxu3 %vm342_vm0, %v438_v44 }
  0xc1   : > { %1106 = vmatmul.msk.f32.gmra.mxu0 %vm342_vm0, %v439_v46  ;;  %1122 = vmatmul.msk.f32.gmra.mxu1 %vm342_vm0, %v439_v46 }
  0xc8   : > { %1138 = vmatmul.msk.f32.gmra.mxu2 %vm342_vm0, %v439_v46  ;;  %1154 = vmatmul.msk.f32.gmra.mxu3 %vm342_vm0, %v439_v46 }
  0xc9   : > { %1107 = vmatmul.msk.f32.gmra.mxu0 %vm342_vm0, %v440_v47  ;;  %1123 = vmatmul.msk.f32.gmra.mxu1 %vm342_vm0, %v440_v47 }
  0xd0   : > { %1139 = vmatmul.msk.f32.gmra.mxu2 %vm342_vm0, %v440_v47  ;;  %1155 = vmatmul.msk.f32.gmra.mxu3 %vm342_vm0, %v440_v47 }
  0xd1   : > { %1108 = vmatmul.msk.f32.gmra.mxu0 %vm342_vm0, %v441_v48  ;;  %1124 = vmatmul.msk.f32.gmra.mxu1 %vm342_vm0, %v441_v48 }
  0xd8   : > { %1140 = vmatmul.msk.f32.gmra.mxu2 %vm342_vm0, %v441_v48  ;;  %1156 = vmatmul.msk.f32.gmra.mxu3 %vm342_vm0, %v441_v48  ;;  %v1519_v48 = vpop.permute.xlu0 %543 }
  0xd9   : > { %1109 = vmatmul.msk.f32.gmra.mxu0 %vm342_vm0, %v442_v49  ;;  %1125 = vmatmul.msk.f32.gmra.mxu1 %vm342_vm0, %v442_v49 }
  0xe0   : > { %1141 = vmatmul.msk.f32.gmra.mxu2 %vm342_vm0, %v442_v49  ;;  %1157 = vmatmul.msk.f32.gmra.mxu3 %vm342_vm0, %v442_v49  ;;  %v1521_v49 = vpop.permute.xlu1 %533 }
  0xe1   : > { %1110 = vmatmul.msk.f32.gmra.mxu0 %vm342_vm0, %v443_v50  ;;  %1126 = vmatmul.msk.f32.gmra.mxu1 %vm342_vm0, %v443_v50 }
  0xe8   : > { %1142 = vmatmul.msk.f32.gmra.mxu2 %vm342_vm0, %v443_v50  ;;  %1158 = vmatmul.msk.f32.gmra.mxu3 %vm342_vm0, %v443_v50  ;;  %v1531_v59 = vpop.permute.xlu1 %513 }
  0xe9   : > { %1111 = vmatmul.msk.f32.gmra.mxu0 %vm342_vm0, %v444_v51  ;;  %1127 = vmatmul.msk.f32.gmra.mxu1 %vm342_vm0, %v444_v51 }
  0xf0   : > { %1143 = vmatmul.msk.f32.gmra.mxu2 %vm342_vm0, %v444_v51  ;;  %1159 = vmatmul.msk.f32.gmra.mxu3 %vm342_vm0, %v444_v51 }
  0xf1   : > { %1112 = vmatmul.msk.f32.gmra.mxu0 %vm342_vm0, %v445_v52  ;;  %1128 = vmatmul.msk.f32.gmra.mxu1 %vm342_vm0, %v445_v52 }
  0xf8   : > { %1144 = vmatmul.msk.f32.gmra.mxu2 %vm342_vm0, %v445_v52  ;;  %1160 = vmatmul.msk.f32.gmra.mxu3 %vm342_vm0, %v445_v52 }
  0xf9   : > { %1113 = vmatmul.msk.f32.gmra.mxu0 %vm342_vm0, %v446_v53  ;;  %1129 = vmatmul.msk.f32.gmra.mxu1 %vm342_vm0, %v446_v53 }
 0x100   : > { %1145 = vmatmul.msk.f32.gmra.mxu2 %vm342_vm0, %v446_v53  ;;  %1161 = vmatmul.msk.f32.gmra.mxu3 %vm342_vm0, %v446_v53 }
 0x101   : > { %1114 = vmatmul.msk.f32.gmra.mxu0 %vm342_vm0, %v447_v54  ;;  %1130 = vmatmul.msk.f32.gmra.mxu1 %vm342_vm0, %v447_v54 }
 0x108   : > { %1146 = vmatmul.msk.f32.gmra.mxu2 %vm342_vm0, %v447_v54  ;;  %1162 = vmatmul.msk.f32.gmra.mxu3 %vm342_vm0, %v447_v54  ;;  %v1527_v54 = vpop.permute.xlu2 %523 }
 0x109   : > { %1115 = vmatmul.msk.f32.gmra.mxu0 %vm342_vm0, %v448_v55  ;;  %1131 = vmatmul.msk.f32.gmra.mxu1 %vm342_vm0, %v448_v55 }
 0x110   : > { %1147 = vmatmul.msk.f32.gmra.mxu2 %vm342_vm0, %v448_v55  ;;  %1163 = vmatmul.msk.f32.gmra.mxu3 %vm342_vm0, %v448_v55  ;;  %v1529_v55 = vpop.permute.xlu0 %518 }
 0x111   : > { %1116 = vmatmul.msk.f32.gmra.mxu0 %vm342_vm0, %v449_v56  ;;  %1132 = vmatmul.msk.f32.gmra.mxu1 %vm342_vm0, %v449_v56 }
 0x116   : > { %v1425_v57 = vpop.f32.mrf.mxu0  ;;  %v1427_v58 = vpop.f32.mrf.mxu1 }
 0x117   : > { %1683 = vst [vmem:[#allocation3_spill] sm:$0xff] %v1427_v58 }
 0x118   : > { %1148 = vmatmul.msk.f32.gmra.mxu2 %vm342_vm0, %v449_v56  ;;  %1164 = vmatmul.msk.f32.gmra.mxu3 %vm342_vm0, %v449_v56 }
 0x11e   : > { %v1431_v60 = vpop.f32.mrf.mxu0  ;;  %v1433_v61 = vpop.f32.mrf.mxu1 }
 0x123   : > { %v1435_v62 = vpop.f32.mrf.mxu2  ;;  %v1437_v63 = vpop.f32.mrf.mxu3 }
 0x124   : > { %1684 = vst [vmem:[#allocation4_spill] sm:$0xff] %v1435_v62 }
 0x125   : > { %1685 = vst [vmem:[#allocation5_spill] sm:$0xff] %v1437_v63 }
 0x126   : > { %v1439_v0 = vpop.f32.mrf.mxu0  ;;  %v1441_v1 = vpop.f32.mrf.mxu1 }
 0x12b   : > { %v1443_v2 = vpop.f32.mrf.mxu2  ;;  %v1445_v3 = vpop.f32.mrf.mxu3 }
 0x12c   : > { %1686 = vst [vmem:[#allocation6_spill] sm:$0xff] %v1443_v2 }
 0x12d   : > { %1687 = vst [vmem:[#allocation7_spill] sm:$0xff] %v1445_v3 }
 0x12e   : > { %v1447_v4 = vpop.f32.mrf.mxu0  ;;  %v1449_v5 = vpop.f32.mrf.mxu1 }
 0x133   : > { %v1451_v6 = vpop.f32.mrf.mxu2  ;;  %v1453_v7 = vpop.f32.mrf.mxu3 }
 0x134   : > { %1688 = vst [vmem:[#allocation8_spill] sm:$0xff] %v1451_v6 }
 0x135   : > { %1689 = vst [vmem:[#allocation9_spill] sm:$0xff] %v1453_v7 }
 0x136   : > { %v1455_v8 = vpop.f32.mrf.mxu0  ;;  %v1457_v9 = vpop.f32.mrf.mxu1 }
 0x13b   : > { %v1459_v10 = vpop.f32.mrf.mxu2  ;;  %v1461_v11 = vpop.f32.mrf.mxu3 }
 0x13c   : > { %1690 = vst [vmem:[#allocation10_spill] sm:$0xff] %v1459_v10 }
 0x13d   : > { %1691 = vst [vmem:[#allocation11_spill] sm:$0xff] %v1461_v11 }
 0x13e   : > { %v1463_v12 = vpop.f32.mrf.mxu0  ;;  %v1465_v13 = vpop.f32.mrf.mxu1 }
 0x143   : > { %v1467_v14 = vpop.f32.mrf.mxu2  ;;  %v1469_v15 = vpop.f32.mrf.mxu3 }
 0x144   : > { %1692 = vst [vmem:[#allocation12_spill] sm:$0xff] %v1467_v14 }
 0x145   : > { %1693 = vst [vmem:[#allocation13_spill] sm:$0xff] %v1469_v15 }
 0x146   : > { %v1471_v16 = vpop.f32.mrf.mxu0  ;;  %v1473_v17 = vpop.f32.mrf.mxu1 }
 0x14b   : > { %v1475_v18 = vpop.f32.mrf.mxu2  ;;  %v1477_v19 = vpop.f32.mrf.mxu3 }
 0x14c   : > { %1694 = vst [vmem:[#allocation14_spill] sm:$0xff] %v1475_v18 }
 0x14d   : > { %1695 = vst [vmem:[#allocation15_spill] sm:$0xff] %v1477_v19  ;;  %v1540_v19 = vpop.permute.xlu2 %508 }
 0x14e   : > { %v1479_v20 = vpop.f32.mrf.mxu0  ;;  %v1481_v21 = vpop.f32.mrf.mxu1 }
 0x153   : > { %v1483_v22 = vpop.f32.mrf.mxu2  ;;  %v1485_v23 = vpop.f32.mrf.mxu3 }
 0x154   : > { %1696 = vst [vmem:[#allocation16_spill] sm:$0xff] %v1483_v22 }
 0x155   : > { %1697 = vst [vmem:[#allocation17_spill] sm:$0xff] %v1485_v23 }
 0x156   : > { %v1487_v24 = vpop.f32.mrf.mxu0  ;;  %v1489_v25 = vpop.f32.mrf.mxu1 }
 0x15b   : > { %v1491_v26 = vpop.f32.mrf.mxu2  ;;  %v1493_v27 = vpop.f32.mrf.mxu3 }
 0x15c   : > { %1698 = vst [vmem:[#allocation18_spill] sm:$0xff] %v1493_v27 }
 0x15e   : > { %v1495_v28 = vpop.f32.mrf.mxu0  ;;  %v1497_v29 = vpop.f32.mrf.mxu1 }
 0x163   : > { %v1499_v30 = vpop.f32.mrf.mxu2  ;;  %v1501_v31 = vpop.f32.mrf.mxu3 }
 0x166   : > { %v641_v32 = vpop.f32.mrf.mxu0  ;;  %v706_v33 = vpop.f32.mrf.mxu1 }
 0x16b   : > { %v1503_v34 = vpop.f32.mrf.mxu2  ;;  %v1505_v35 = vpop.f32.mrf.mxu3 }
 0x16e   : > { %v644_v36 = vpop.f32.mrf.mxu0  ;;  %v709_v37 = vpop.f32.mrf.mxu1 }
 0x173   : > { %v1507_v38 = vpop.f32.mrf.mxu2  ;;  %v1509_v39 = vpop.f32.mrf.mxu3 }
 0x176   : > { %v647_v40 = vpop.f32.mrf.mxu0  ;;  %v712_v41 = vpop.f32.mrf.mxu1 }
 0x17b   : > { %v1513_v43 = vpop.f32.mrf.mxu2  ;;  %v1515_v44 = vpop.f32.mrf.mxu3 }
 0x17e   : > { %v650_v46 = vpop.f32.mrf.mxu0  ;;  %v715_v47 = vpop.f32.mrf.mxu1 }
 0x17f   : > { %v651_v10 = vadd.f32 %v650_v46, %v1521_v49  ;;  %v716_v18 = vadd.f32 %v715_v47, %v1521_v49  ;;  %v710_v46 = vadd.f32 %v709_v37, %v1527_v54  ;;  %v1559_v37 = vpop.permute.xlu2 %493 }
 0x183   : > { %v1523_v50 = vpop.f32.mrf.mxu2  ;;  %v1525_v51 = vpop.f32.mrf.mxu3 }
 0x186   : > { %v653_v52 = vpop.f32.mrf.mxu0  ;;  %v718_v53 = vpop.f32.mrf.mxu1 }
 0x187   : > { %v654_v62 = vadd.f32 %v653_v52, %v1511_v42  ;;  %v719_v3 = vadd.f32 %v718_v53, %v1511_v42  ;;  %v648_v52 = vadd.f32 %v647_v40, %v1517_v45  ;;  %v1544_v53 = vpop.permute.xlu0 %503 }
 0x189   : > { %v910_v15 = vmax.f32 %v654_v62, 0.0  ;;  %v911_v23 = vmax.f32 %v719_v3, 0.0  ;;  %v906_v62 = vmax.f32 %v651_v10, 0.0  ;;  %v907_v3 = vmax.f32 %v716_v18, 0.0 }
 0x18a   : > { %v902_v40 = vmax.f32 %v648_v52, 0.0  ;;  %v704_v10 = vadd.f32 %v1497_v29, %v1531_v59  ;;  %v636_v18 = vadd.f32 %v1487_v24, %v1540_v19  ;;  %v633_v29 = vadd.f32 %v1479_v20, %v1544_v53 }
 0x18b   : > { %v780_v56 = vpop.f32.mrf.mxu2  ;;  %v1533_v63 = vpop.f32.mrf.mxu3 }
 0x18c   : > { %v886_v20 = vmax.f32 %v636_v18, 0.0 }
 0x18e   : > { %v656_v2 = vpop.f32.mrf.mxu0  ;;  %v721_v6 = vpop.f32.mrf.mxu1 }
 0x18f   : > { %v657_v7 = vadd.f32 %v656_v2, %v1519_v48  ;;  %v722_v11 = vadd.f32 %v721_v6, %v1519_v48  ;;  %v713_v2 = vadd.f32 %v712_v41, %v1517_v45  ;;  %v645_v6 = vadd.f32 %v644_v36, %v1527_v54 }
 0x191   : > { %v914_v14 = vmax.f32 %v657_v7, 0.0  ;;  %v915_v22 = vmax.f32 %v722_v11, 0.0  ;;  %v1548_v7 = vpop.permute.xlu1 %498  ;;  %v642_v11 = vadd.f32 %v641_v32, %v1529_v55  ;;  %v903_v47 = vmax.f32 %v713_v2, 0.0 }
 0x192   : > { %v898_v36 = vmax.f32 %v645_v6, 0.0 }
 0x193   : > { %v783_v58 = vpop.f32.mrf.mxu2  ;;  %926 = vmatpush.msra.mxu0 %v914_v14  ;;  %v848_v27 = vpop.f32.mrf.mxu3  ;;  %946 = vmatpush.msra.mxu1 %v915_v22  ;;  %v707_v14 = vadd.f32 %v706_v33, %v1529_v55  ;;  %v639_v22 = vadd.f32 %v1495_v28, %v1531_v59  ;;  %v701_v33 = vadd.f32 %v1489_v25, %v1540_v19 }
 0x194   : > { %v784_v28 = vadd.f32 %v783_v58, %v1511_v42  ;;  %v849_v24 = vadd.f32 %v848_v27, %v1511_v42  ;;  %v698_v25 = vadd.f32 %v1481_v21, %v1544_v53  ;;  %v781_v58 = vadd.f32 %v780_v56, %v1521_v49 }
 0x195   : > { %927 = vmatpush.msra.mxu0 %v910_v15  ;;  %947 = vmatpush.msra.mxu1 %v911_v23  ;;  %v899_v15 = vmax.f32 %v710_v46, 0.0  ;;  %v894_v23 = vmax.f32 %v642_v11, 0.0  ;;  %v895_v41 = vmax.f32 %v707_v14, 0.0  ;;  %v890_v6 = vmax.f32 %v639_v22, 0.0  ;;  %v1569_v46 = vpop.permute.xlu0 %488 }
 0x196   : > { %v846_v27 = vadd.f32 %v1533_v63, %v1521_v49  ;;  %v695_v14 = vadd.f32 %v1473_v17, %v1548_v7  ;;  %v887_v21 = vmax.f32 %v701_v33, 0.0  ;;  %v778_v56 = vadd.f32 %v1523_v50, %v1517_v45  ;;  %v1606_v33 = vpop.permute.xlu2 %478 }
 0x197   : > { %928 = vmatpush.msra.mxu0 %v906_v62  ;;  %948 = vmatpush.msra.mxu1 %v907_v3  ;;  %v891_v3 = vmax.f32 %v704_v10, 0.0  ;;  %v882_v22 = vmax.f32 %v633_v29, 0.0  ;;  %v843_v63 = vadd.f32 %v1525_v51, %v1517_v45  ;;  %v913_v49 = vmax.f32 %v849_v24, 0.0 }
 0x198   : > { %v692_v17 = vadd.f32 %v1465_v13, %v1559_v37  ;;  %v775_v50 = vadd.f32 %v1513_v43, %v1527_v54  ;;  %v908_v10 = vmax.f32 %v781_v58, 0.0  ;;  %v840_v45 = vadd.f32 %v1515_v44, %v1527_v54 }
 0x199   : > { %929 = vmatpush.msra.mxu0 %v902_v40  ;;  %949 = vmatpush.msra.mxu1 %v903_v47  ;;  %v630_v40 = vadd.f32 %v1471_v16, %v1548_v7  ;;  %v912_v47 = vmax.f32 %v784_v28, 0.0  ;;  %v627_v16 = vadd.f32 %v1463_v12, %v1559_v37  ;;  %v624_v12 = vadd.f32 %v1455_v8, %v1569_v46 }
 0x19a   : > { %v909_v51 = vmax.f32 %v846_v27, 0.0  ;;  %v689_v13 = vadd.f32 %v1457_v9, %v1569_v46  ;;  %v879_v18 = vmax.f32 %v695_v14, 0.0  ;;  %v772_v43 = vadd.f32 %v1507_v38, %v1529_v55 }
 0x19b   : > { %v786_v32 = vpop.f32.mrf.mxu2  ;;  %930 = vmatpush.msra.mxu0 %v898_v36  ;;  %v851_v2 = vpop.f32.mrf.mxu3  ;;  %950 = vmatpush.msra.mxu1 %v899_v15  ;;  %v883_v36 = vmax.f32 %v698_v25, 0.0  ;;  %v878_v15 = vmax.f32 %v630_v40, 0.0  ;;  %v837_v44 = vadd.f32 %v1509_v39, %v1529_v55  ;;  %v905_v54 = vmax.f32 %v843_v63, 0.0  ;;  %v1704_v63 = vld [vmem:[#allocation15_spill] sm:$0xff] }
 0x19c   : > { %v787_v52 = vadd.f32 %v786_v32, %v1519_v48  ;;  %v852_v62 = vadd.f32 %v851_v2, %v1519_v48  ;;  %v1578_v48 = vpop.permute.xlu1 %483  ;;  %v874_v32 = vmax.f32 %v627_v16, 0.0  ;;  %v769_v38 = vadd.f32 %v1503_v34, %v1531_v59 }
 0x19d   : > { %931 = vmatpush.msra.mxu0 %v894_v23  ;;  %951 = vmatpush.msra.mxu1 %v895_v41  ;;  %v904_v23 = vmax.f32 %v778_v56, 0.0  ;;  %v621_v8 = vadd.f32 %v1447_v4, %v1578_v48  ;;  %v686_v9 = vadd.f32 %v1449_v5, %v1578_v48  ;;  %v875_v41 = vmax.f32 %v692_v17, 0.0  ;;  %v1614_v5 = vpop.permute.xlu0 %473 }
 0x19e   : > { %v916_v11 = vmax.f32 %v787_v52, 0.0  ;;  %v917_v42 = vmax.f32 %v852_v62, 0.0  ;;  %v900_v28 = vmax.f32 %v775_v50, 0.0  ;;  %v870_v4 = vmax.f32 %v624_v12, 0.0  ;;  %v1705_v50 = vld [vmem:[#allocation12_spill] sm:$0xff] }
 0x19f   : > { %932 = vmatpush.msra.mxu0 %v890_v6  ;;  %952 = vmatpush.msra.mxu1 %v891_v3  ;;  %v834_v52 = vadd.f32 %v1505_v35, %v1531_v59  ;;  %v901_v39 = vmax.f32 %v840_v45, 0.0  ;;  %v618_v55 = vadd.f32 %v1439_v0, %v1606_v33  ;;  %v871_v2 = vmax.f32 %v689_v13, 0.0  ;;  %v1706_v45 = vld [vmem:[#allocation13_spill] sm:$0xff] }
 0x1a0   : > { %966 = vmatpush.msra.mxu2 %v916_v11  ;;  %986 = vmatpush.msra.mxu3 %v917_v42  ;;  %v766_v29 = vadd.f32 %v1499_v30, %v1540_v19  ;;  %v896_v34 = vmax.f32 %v772_v43, 0.0  ;;  %v683_v6 = vadd.f32 %v1441_v1, %v1606_v33  ;;  %v615_v35 = vadd.f32 %v1431_v60, %v1614_v5 }
 0x1a1   : > { %933 = vmatpush.msra.mxu0 %v886_v20  ;;  %953 = vmatpush.msra.mxu1 %v887_v21  ;;  %v866_v59 = vmax.f32 %v621_v8, 0.0  ;;  %v831_v24 = vadd.f32 %v1501_v31, %v1540_v19  ;;  %v897_v0 = vmax.f32 %v837_v44, 0.0  ;;  %v680_v62 = vadd.f32 %v1433_v61, %v1614_v5  ;;  %v1699_v19 = vld [vmem:[#allocation18_spill] sm:$0xff]  ;;  %v1700_v61 = vld [vmem:[#allocation3_spill] sm:$0xff]  ;;  %v1701_v20 = vld [vmem:[#allocation16_spill] sm:$0xff] }
 0x1a2   : > { %967 = vmatpush.msra.mxu2 %v912_v47  ;;  %987 = vmatpush.msra.mxu3 %v913_v49  ;;  %v867_v25 = vmax.f32 %v686_v9, 0.0  ;;  %v763_v3 = vadd.f32 %v1491_v26, %v1544_v53  ;;  %v892_v1 = vmax.f32 %v769_v38, 0.0  ;;  %v828_v31 = vadd.f32 %v1699_v19, %v1544_v53  ;;  %v1703_v47 = vld [vmem:[#allocation14_spill] sm:$0xff]  ;;  %v1709_v44 = vld [vmem:[#allocation8_spill] sm:$0xff] }
 0x1a3   : > { %934 = vmatpush.msra.mxu0 %v882_v22  ;;  %954 = vmatpush.msra.mxu1 %v883_v36  ;;  %v893_v58 = vmax.f32 %v834_v52, 0.0  ;;  %v862_v11 = vmax.f32 %v618_v55, 0.0  ;;  %v760_v27 = vadd.f32 %v1701_v20, %v1548_v7  ;;  %v888_v26 = vmax.f32 %v766_v29, 0.0 }
 0x1a4   : > { %968 = vmatpush.msra.mxu2 %v908_v10  ;;  %988 = vmatpush.msra.mxu3 %v909_v51  ;;  %v1626_v30 = vpop.permute.xlu1 %468  ;;  %v863_v42 = vmax.f32 %v683_v6, 0.0  ;;  %v858_v14 = vmax.f32 %v615_v35, 0.0  ;;  %v889_v56 = vmax.f32 %v831_v24, 0.0  ;;  %v859_v53 = vmax.f32 %v680_v62, 0.0  ;;  %v1714_v6 = vld [vmem:[#allocation5_spill] sm:$0xff] }
 0x1a5   : > { %935 = vmatpush.msra.mxu0 %v878_v15  ;;  %955 = vmatpush.msra.mxu1 %v879_v18  ;;  %v612_v60 = vadd.f32 %v1425_v57, %v1626_v30  ;;  %v677_v40 = vadd.f32 %v1700_v61, %v1626_v30  ;;  %v1702_v57 = vld [vmem:[#allocation17_spill] sm:$0xff]  ;;  %v757_v16 = vadd.f32 %v1703_v47, %v1559_v37  ;;  %v884_v22 = vmax.f32 %v763_v3, 0.0  ;;  %v918_v15 = vld [vmem:[%s1680_s6] sm:$0x1] }
 0x1a6   : > { %969 = vmatpush.msra.mxu2 %v904_v23  ;;  %989 = vmatpush.msra.mxu3 %v905_v54  ;;  %v825_v21 = vadd.f32 %v1702_v57, %v1548_v7  ;;  %v822_v49 = vadd.f32 %v1704_v63, %v1559_v37  ;;  %v885_v17 = vmax.f32 %v828_v31, 0.0  ;;  %v754_v7 = vadd.f32 %v1705_v50, %v1569_v46  ;;  %v1707_v37 = vld [vmem:[#allocation10_spill] sm:$0xff]  ;;  %v1708_v23 = vld [vmem:[#allocation11_spill] sm:$0xff] }
 0x1a7   : > { %936 = vmatpush.msra.mxu0 %v874_v32  ;;  %956 = vmatpush.msra.mxu1 %v875_v41  ;;  %v854_v36 = vmax.f32 %v612_v60, 0.0  ;;  %v880_v10 = vmax.f32 %v760_v27, 0.0  ;;  %v855_v12 = vmax.f32 %v677_v40, 0.0  ;;  %v819_v51 = vadd.f32 %v1706_v45, %v1569_v46  ;;  %v1710_v46 = vld [vmem:[#allocation9_spill] sm:$0xff] }
 0x1a8   : > { %970 = vmatpush.msra.mxu2 %v900_v28  ;;  %990 = vmatpush.msra.mxu3 %v901_v39  ;;  %v881_v13 = vmax.f32 %v825_v21, 0.0  ;;  %v751_v18 = vadd.f32 %v1707_v37, %v1578_v48  ;;  %v876_v43 = vmax.f32 %v757_v16, 0.0  ;;  %v816_v8 = vadd.f32 %v1708_v23, %v1578_v48  ;;  %v1711_v28 = vld [vmem:[#allocation6_spill] sm:$0xff]  ;;  %v1712_v48 = vld [vmem:[#allocation7_spill] sm:$0xff] }
 0x1a9   : > { %937 = vmatpush.msra.mxu0 %v870_v4  ;;  %957 = vmatpush.msra.mxu1 %v871_v2  ;;  %v877_v32 = vmax.f32 %v822_v49, 0.0  ;;  %v748_v54 = vadd.f32 %v1709_v44, %v1606_v33  ;;  %v872_v9 = vmax.f32 %v754_v7, 0.0  ;;  %v813_v41 = vadd.f32 %v1710_v46, %v1606_v33  ;;  %v1713_v2 = vld [vmem:[#allocation4_spill] sm:$0xff] }
 0x1aa   : > { %971 = vmatpush.msra.mxu2 %v896_v34  ;;  %991 = vmatpush.msra.mxu3 %v897_v0  ;;  %v873_v38 = vmax.f32 %v819_v51, 0.0  ;;  %v745_v4 = vadd.f32 %v1711_v28, %v1614_v5  ;;  %v868_v52 = vmax.f32 %v751_v18, 0.0  ;;  %v810_v39 = vadd.f32 %v1712_v48, %v1614_v5  ;;  %v923_v5 = vpop.permute.xlu2 %922 }
 0x1ab   : > { %938 = vmatpush.msra.mxu0 %v866_v59  ;;  %958 = vmatpush.msra.mxu1 %v867_v25  ;;  %v869_v55 = vmax.f32 %v816_v8, 0.0  ;;  %v742_v29 = vadd.f32 %v1713_v2, %v1626_v30  ;;  %v864_v34 = vmax.f32 %v748_v54, 0.0  ;;  %v807_v33 = vadd.f32 %v1714_v6, %v1626_v30 }
 0x1ac   : > { %972 = vmatpush.msra.mxu2 %v892_v1  ;;  %992 = vmatpush.msra.mxu3 %v893_v58  ;;  %v865_v35 = vmax.f32 %v813_v41, 0.0  ;;  %v860_v59 = vmax.f32 %v745_v4, 0.0  ;;  %v861_v24 = vmax.f32 %v810_v39, 0.0  ;;  %v925_v3 = vperm.slane %v923_v5, 0 }
 0x1ad   : > { %939 = vmatpush.msra.mxu0 %v862_v11  ;;  %959 = vmatpush.msra.mxu1 %v863_v42  ;;  %v856_v0 = vmax.f32 %v742_v29, 0.0  ;;  %v857_v62 = vmax.f32 %v807_v33, 0.0  ;;  %v1020_v58 = vlaneseq }
 0x1ae   : > { %973 = vmatpush.msra.mxu2 %v888_v26  ;;  %993 = vmatpush.msra.mxu3 %v889_v56 }
 0x1af   : > { %940 = vmatpush.msra.mxu0 %v858_v14  ;;  %960 = vmatpush.msra.mxu1 %v859_v53  ;;  %vm1022_vm4 = vcmp.lt.s32.totalorder %v1020_v58, 512 }
 0x1b0   : > { %974 = vmatpush.msra.mxu2 %v884_v22  ;;  %994 = vmatpush.msra.mxu3 %v885_v17 }
 0x1b1   : > { %941 = vmatpush.msra.mxu0 %v854_v36  ;;  %961 = vmatpush.msra.mxu1 %v855_v12 }
 0x1b2   : > { %975 = vmatpush.msra.mxu2 %v880_v10  ;;  %995 = vmatpush.msra.mxu3 %v881_v13 }
 0x1b3   : > { %942 = vmatmul.f32.vlgmr.msra.gmra.mxu0 %v918_v15  ;;  %962 = vmatmul.f32.vlgmr.msra.gmra.mxu1 %v918_v15 }
 0x1b4   : > { %976 = vmatpush.msra.mxu2 %v876_v43  ;;  %996 = vmatpush.msra.mxu3 %v877_v32 }
 0x1b6   : > { %977 = vmatpush.msra.mxu2 %v872_v9  ;;  %997 = vmatpush.msra.mxu3 %v873_v38 }
 0x1b8   : > { %978 = vmatpush.msra.mxu2 %v868_v52  ;;  %998 = vmatpush.msra.mxu3 %v869_v55 }
 0x1ba   : > { %979 = vmatpush.msra.mxu2 %v864_v34  ;;  %999 = vmatpush.msra.mxu3 %v865_v35 }
 0x1bc   : > { %980 = vmatpush.msra.mxu2 %v860_v59  ;;  %1000 = vmatpush.msra.mxu3 %v861_v24 }
 0x1be   : > { %981 = vmatpush.msra.mxu2 %v856_v0  ;;  %1001 = vmatpush.msra.mxu3 %v857_v62 }
 0x1bf   : > { %982 = vmatmul.f32.vlgmr.msra.gmra.mxu2 %v918_v15  ;;  %1002 = vmatmul.f32.vlgmr.msra.gmra.mxu3 %v918_v15 }
 0x230   : > { %v963_v25 = vpop.f32.mrf.mxu1  ;;  %v943_v60 = vpop.f32.mrf.mxu0 }
 0x231   : > { %v964_v1 = vadd.f32 %v963_v25, %v925_v3  ;;  %v944_v20 = vadd.f32 %v943_v60, %v925_v3 }
 0x233   : > { %v1010_v11 = vrot.slane %v964_v1, 7 }
 0x235   : > { %v1014_v26 = vsel %vm1013_vm1, %v944_v20, %v1010_v11 }
 0x242   : > { %v983_v30 = vpop.f32.mrf.mxu2  ;;  %v1003_v31 = vpop.f32.mrf.mxu3 }
 0x243   : > { %v984_v19 = vadd.f32 %v983_v30, %v925_v3  ;;  %v1004_v61 = vadd.f32 %v1003_v31, %v925_v3 }
 0x245   : > { %v1011_v40 = vrot.slane %v984_v19, 6  ;;  %v1012_v27 = vrot.slane %v1004_v61, 5 }
 0x247   : > { %v1016_v42 = vsel %vm1015_vm2, %v1011_v40, %v1012_v27 }
 0x248   : > { %v1018_v14 = vsel %vm1017_vm3, %v1014_v26, %v1016_v42 }
 0x249   : > { %1024 = vst.msk [vmem:[%s329_s25] sm:$0xf] %vm1022_vm4, %v1018_v14 }
 0x24a PF: > { %s20_s29 = sadd.s32 1, %s1185_s29  }
 0x24b   : > { %p17_p4 = scmp.ge.s32.totalorder %s20_s29, 4  }
 0x24d   :  { %19 = sbr.rel (!%p17_p4) target bundleno = 3 (0x3), region = 85 }

</bundles_post_ra>
